<compile_context>
chip_gen: v7x
topology: tpu7x:2x2x1
jax: 0.10.0
libtpu: 0.0.40
codegen_flags: <defaults>
</compile_context>

<pallas_src>
import functools
import math

import jax
import jax.numpy as jnp
from jax import lax
from jax.experimental import pallas as pl
from jax.experimental.pallas import tpu as pltpu

EPS = 1e-5


# ---------------------------------------------------------------------------
# Small static helpers (trace-time only)
# ---------------------------------------------------------------------------
def _round_up(v, m):
    return -(-v // m) * m


def _tile_bytes(shape, dtype):
    """Approximate VMEM footprint of a block, accounting for (sublane, lane) padding."""
    itemsize = jnp.dtype(dtype).itemsize
    s = list(shape) if len(shape) >= 2 else [1] + list(shape)
    sub = {4: 8, 2: 16, 1: 32}.get(itemsize, 8)
    s[-1] = _round_up(s[-1], 128)
    s[-2] = _round_up(s[-2], sub)
    return math.prod(s) * itemsize


def _vmem_limit(double_buffered_bytes, resident_bytes):
    """Explicit scoped-VMEM limit: 2x for double-buffered blocks, 2x headroom, 64 MiB cap."""
    est = 2 * double_buffered_bytes + resident_bytes
    est = 2 * est + (2 << 20)
    return int(min(max(est, 8 << 20), 64 << 20))


def _pick_row_chunk(Ho, Wo, Cin, budget_bytes=2 << 20, max_chunks=8):
    """Output-row chunk so the bf16 im2col patch stays <= budget (bounded VMEM on v7x)."""
    row_bytes = max(Wo * 9 * Cin * 2, 1)          # bf16 patch bytes per output row
    th = max(1, budget_bytes // row_bytes)
    th = min(th, Ho)
    th = max(th, -(-Ho // max_chunks))            # cap static unroll count
    return int(th)


def _fold_for_lanes(total_rows, c, target_lanes=512):
    """Largest f | total_rows with f*c <= target_lanes (fold spatial into lanes for K3)."""
    max_f = max(1, target_lanes // max(c, 1))
    best = 1
    for f in range(1, min(total_rows, max_f) + 1):
        if total_rows % f == 0:
            best = f
    return best


def _pick_row_tile(rows, target=1024):
    """Row-tile for K3: full extent if small, else largest multiple-of-8 divisor <= target."""
    if rows <= target:
        return rows
    best = rows
    for t in range(8, target + 1, 8):
        if rows % t == 0:
            best = t
    return best


# ---------------------------------------------------------------------------
# Shared in-kernel helpers
# ---------------------------------------------------------------------------
def _zero_pad_border(pad_ref):
    """Zero only the 1-px border each step (interior is fully overwritten every step)."""
    Hp, Wp, C = pad_ref.shape
    z_row = jnp.zeros((1, Wp, C), pad_ref.dtype)
    pad_ref[0:1, :, :] = z_row
    pad_ref[Hp - 1:Hp, :, :] = z_row
    z_col = jnp.zeros((Hp, 1, C), pad_ref.dtype)
    pad_ref[:, 0:1, :] = z_col
    pad_ref[:, Wp - 1:Wp, :] = z_col


def _conv_im2col(pad_ref, w_ref, o_ref, s_ref, row_chunk):
    """bf16 padded activation in VMEM -> im2col (row-chunked) -> K=9*Cin MXU matmuls ->
    bf16 pre-BN conv output + f32 per-block BN partials (sum, sum of squares)."""
    Hp, Wp, Cin = pad_ref.shape
    Ho, Wo = Hp - 2, Wp - 2
    Cout = o_ref.shape[-1]

    # Three dx-shifted bf16 planes built once per image (2 unaligned sublane slices
    # instead of 6); the 9 taps below are cheap leading-dim (dy) slices of these planes.
    planes = jnp.concatenate([pad_ref[:, dx:dx + Wo, :] for dx in range(3)],
                             axis=-1)                         # (Hp, Wo, 3*Cin) bf16

    tot_sum = jnp.zeros((1, Cout), jnp.float32)
    tot_sq = jnp.zeros((1, Cout), jnp.float32)
    r0 = 0
    while r0 < Ho:                                            # static Python loop
        th = min(row_chunk, Ho - r0)
        taps = [planes[r0 + dy:r0 + dy + th] for dy in range(3)]   # (th, Wo, 3*Cin)
        # (dy, dx, cin) lane ordering matches the HWIO -> (9*Cin, Cout) weight flattening.
        patch = jnp.concatenate(taps, axis=-1).reshape(th * Wo, 9 * Cin)   # bf16
        acc = jnp.dot(patch, w_ref[...], preferred_element_type=jnp.float32)
        tot_sum = tot_sum + jnp.sum(acc, axis=0, keepdims=True)
        tot_sq = tot_sq + jnp.sum(acc * acc, axis=0, keepdims=True)
        o_ref[0, r0:r0 + th] = acc.reshape(th, Wo, Cout).astype(o_ref.dtype)
        r0 += th

    s_ref[0, 0:1, :] = tot_sum
    s_ref[0, 1:2, :] = tot_sq


# ---------------------------------------------------------------------------
# Kernel 1: fused MaxPool2x2 + conv1 + BN partial stats              grid = (N,)
# ---------------------------------------------------------------------------
def _pool_conv1_kernel(x_ref, w_ref, o_ref, s_ref, pad_ref, *, row_chunk):
    # x_ref: (1, Ho, 2, Wo, 2*Cin) f32   one image, pool factors exposed by free reshape
    # w_ref: (9*Cin, Cout) bf16          flattened HWIO conv1 weights
    # o_ref: (1, Ho, Wo, Cout) bf16      pre-BN conv1 output
    # s_ref: (1, 2, Cout) f32            [sum, sum_sq] over this image
    Cin = pad_ref.shape[-1]
    img = x_ref[0]                                    # (Ho, 2, Wo, 2*Cin)
    m = jnp.maximum(img[:, 0], img[:, 1])             # max over the 2 pooled rows
    pooled = jnp.maximum(m[..., :Cin], m[..., Cin:])  # max over the 2 pooled cols
    Ho, Wo = pooled.shape[0], pooled.shape[1]
    _zero_pad_border(pad_ref)
    pad_ref[1:Ho + 1, 1:Wo + 1, :] = pooled.astype(pad_ref.dtype)   # cast to bf16 here
    _conv_im2col(pad_ref, w_ref, o_ref, s_ref, row_chunk)


# ---------------------------------------------------------------------------
# Kernel 2: BN1 (folded scale/shift) + ReLU + conv2 + BN partials    grid = (N,)
# ---------------------------------------------------------------------------
def _bn_relu_conv2_kernel(y_ref, scale_ref, shift_ref, w_ref, o_ref, s_ref, pad_ref,
                          *, row_chunk):
    Hp, Wp, C1 = pad_ref.shape
    Ho, Wo = Hp - 2, Wp - 2
    y = y_ref[0].astype(jnp.float32)                               # (Ho, Wo, C1)
    act = jnp.maximum(y * scale_ref[...] + shift_ref[...], 0.0)    # BN (batch stats) + ReLU
    _zero_pad_border(pad_ref)
    pad_ref[1:Ho + 1, 1:Wo + 1, :] = act.astype(pad_ref.dtype)     # bf16
    _conv_im2col(pad_ref, w_ref, o_ref, s_ref, row_chunk)


# ---------------------------------------------------------------------------
# Kernel 3: BN2 (folded scale/shift) + ReLU, lane-dense streaming    grid = (R//TR,)
# ---------------------------------------------------------------------------
def _bn_relu_out_kernel(y_ref, scale_ref, shift_ref, o_ref):
    y = y_ref[...].astype(jnp.float32)                             # (TR, L)
    o_ref[...] = jnp.maximum(y * scale_ref[...] + shift_ref[...], 0.0)


# ---------------------------------------------------------------------------
# pallas_call wrappers
# ---------------------------------------------------------------------------
def pool_conv_stats(x_nhwc, w_flat_bf16):
    N, H, W, Cin = x_nhwc.shape
    assert H % 2 == 0 and W % 2 == 0, "MaxPool2d(2,2) path assumes even H, W"
    Ho, Wo = H // 2, W // 2
    Cout = w_flat_bf16.shape[-1]
    # Free contiguous reshape: expose the 2x2 pooling factors (no data duplication).
    x5 = x_nhwc.reshape(N, Ho, 2, Wo, 2 * Cin)
    row_chunk = _pick_row_chunk(Ho, Wo, Cin)

    blk = (_tile_bytes((1, Ho, 2, Wo, 2 * Cin), x_nhwc.dtype)
           + _tile_bytes((9 * Cin, Cout), jnp.bfloat16)
           + _tile_bytes((1, Ho, Wo, Cout), jnp.bfloat16)
           + _tile_bytes((1, 2, Cout), jnp.float32))
    resident = (_tile_bytes((Ho + 2, Wo + 2, Cin), jnp.bfloat16)         # pad scratch
                + _tile_bytes((Ho + 2, Wo, 3 * Cin), jnp.bfloat16)       # dx planes
                + _tile_bytes((row_chunk * Wo, 9 * Cin), jnp.bfloat16)   # im2col patch
                + _tile_bytes((row_chunk * Wo, Cout), jnp.float32))      # f32 acc

    kernel = functools.partial(_pool_conv1_kernel, row_chunk=row_chunk)
    return pl.pallas_call(
        kernel,
        grid=(N,),
        in_specs=[
            pl.BlockSpec((1, Ho, 2, Wo, 2 * Cin), lambda n: (n, 0, 0, 0, 0)),
            pl.BlockSpec((9 * Cin, Cout), lambda n: (0, 0)),
        ],
        out_specs=(
            pl.BlockSpec((1, Ho, Wo, Cout), lambda n: (n, 0, 0, 0)),
            pl.BlockSpec((1, 2, Cout), lambda n: (n, 0, 0)),
        ),
        out_shape=(
            jax.ShapeDtypeStruct((N, Ho, Wo, Cout), jnp.bfloat16),
            jax.ShapeDtypeStruct((N, 2, Cout), jnp.float32),
        ),
        scratch_shapes=[pltpu.VMEM((Ho + 2, Wo + 2, Cin), jnp.bfloat16)],
        compiler_params=pltpu.CompilerParams(
            dimension_semantics=("parallel",),
            vmem_limit_bytes=_vmem_limit(blk, resident)),
    )(x5, w_flat_bf16)


def bn_relu_conv_stats(y1, scale1, shift1, w_flat_bf16):
    N, Ho, Wo, C1 = y1.shape
    Cout = w_flat_bf16.shape[-1]
    row_chunk = _pick_row_chunk(Ho, Wo, C1)

    blk = (_tile_bytes((1, Ho, Wo, C1), jnp.bfloat16)
           + 2 * _tile_bytes((1, C1), jnp.float32)
           + _tile_bytes((9 * C1, Cout), jnp.bfloat16)
           + _tile_bytes((1, Ho, Wo, Cout), jnp.bfloat16)
           + _tile_bytes((1, 2, Cout), jnp.float32))
    resident = (_tile_bytes((Ho + 2, Wo + 2, C1), jnp.bfloat16)
                + _tile_bytes((Ho + 2, Wo, 3 * C1), jnp.bfloat16)
                + _tile_bytes((row_chunk * Wo, 9 * C1), jnp.bfloat16)
                + _tile_bytes((row_chunk * Wo, Cout), jnp.float32)
                + _tile_bytes((Ho, Wo, C1), jnp.float32))                # f32 act temp

    kernel = functools.partial(_bn_relu_conv2_kernel, row_chunk=row_chunk)
    return pl.pallas_call(
        kernel,
        grid=(N,),
        in_specs=[
            pl.BlockSpec((1, Ho, Wo, C1), lambda n: (n, 0, 0, 0)),
            pl.BlockSpec((1, C1), lambda n: (0, 0)),
            pl.BlockSpec((1, C1), lambda n: (0, 0)),
            pl.BlockSpec((9 * C1, Cout), lambda n: (0, 0)),
        ],
        out_specs=(
            pl.BlockSpec((1, Ho, Wo, Cout), lambda n: (n, 0, 0, 0)),
            pl.BlockSpec((1, 2, Cout), lambda n: (n, 0, 0)),
        ),
        out_shape=(
            jax.ShapeDtypeStruct((N, Ho, Wo, Cout), jnp.bfloat16),
            jax.ShapeDtypeStruct((N, 2, Cout), jnp.float32),
        ),
        scratch_shapes=[pltpu.VMEM((Ho + 2, Wo + 2, C1), jnp.bfloat16)],
        compiler_params=pltpu.CompilerParams(
            dimension_semantics=("parallel",),
            vmem_limit_bytes=_vmem_limit(blk, resident)),
    )(y1, scale1.reshape(1, C1), shift1.reshape(1, C1), w_flat_bf16)


def bn_relu_finalize(y2, scale, shift):
    """Lane-dense streaming BN+ReLU: fold spatial positions into the lane axis so the
    last dim is >=128 wherever possible (unmasked stores), then row-tile."""
    N, Ho, Wo, C2 = y2.shape
    total_rows = N * Ho * Wo
    f = _fold_for_lanes(total_rows, C2)        # f | total_rows, f*C2 <= 512
    L = f * C2
    R = total_rows // f
    TR = _pick_row_tile(R)

    y_flat = y2.reshape(R, L)                                  # free contiguous reshape
    scale_row = jnp.tile(scale, f).reshape(1, L)               # channel period preserved
    shift_row = jnp.tile(shift, f).reshape(1, L)

    blk = (_tile_bytes((TR, L), jnp.bfloat16)
           + 2 * _tile_bytes((1, L), jnp.float32)
           + _tile_bytes((TR, L), jnp.float32))

    out = pl.pallas_call(
        _bn_relu_out_kernel,
        grid=(R // TR,),
        in_specs=[
            pl.BlockSpec((TR, L), lambda r: (r, 0)),
            pl.BlockSpec((1, L), lambda r: (0, 0)),
            pl.BlockSpec((1, L), lambda r: (0, 0)),
        ],
        out_specs=pl.BlockSpec((TR, L), lambda r: (r, 0)),
        out_shape=jax.ShapeDtypeStruct((R, L), jnp.float32),
        compiler_params=pltpu.CompilerParams(
            dimension_semantics=("parallel",),
            vmem_limit_bytes=_vmem_limit(blk, 0)),
    )(y_flat, scale_row, shift_row)
    return out.reshape(N, Ho, Wo, C2)


# ---------------------------------------------------------------------------
# BN finalization (tiny plain-JAX op between pallas_calls; hoisted out of kernels)
# ---------------------------------------------------------------------------
def _bn_fold(stats, gamma, beta, count):
    totals = jnp.sum(stats, axis=0)                   # (2, C): [sum, sum_sq]
    mean = totals[0] / count
    var = jnp.maximum(totals[1] / count - mean * mean, 0.0)   # biased batch variance
    inv_std = lax.rsqrt(var + EPS)
    scale = gamma * inv_std
    shift = beta - mean * scale
    return scale.astype(jnp.float32), shift.astype(jnp.float32)


# ---------------------------------------------------------------------------
# Parameter init (deterministic, PyTorch-like default ranges) + forward glue.
# ---------------------------------------------------------------------------
def init_downsample_params(key, in_channels, out_channels):
    def conv_params(k, cin, cout):
        kw, kb = jax.random.split(k)
        fan_in = cin * 9
        bound = 1.0 / (fan_in ** 0.5)
        return dict(
            w=jax.random.uniform(kw, (3, 3, cin, cout), jnp.float32, -bound, bound),
            # Conv bias kept for parity with nn.Conv2d, but it is mathematically a
            # no-op before training-mode BatchNorm (mean subtraction cancels it),
            # so the kernels never read it.
            b=jax.random.uniform(kb, (cout,), jnp.float32, -bound, bound),
            gamma=jnp.ones((cout,), jnp.float32),    # BatchNorm2d default weight
            beta=jnp.zeros((cout,), jnp.float32),    # BatchNorm2d default bias
        )

    k1, k2 = jax.random.split(key)
    return {
        "conv1": conv_params(k1, in_channels, out_channels),
        "conv2": conv_params(k2, out_channels, out_channels),
    }


def downsample_forward(params, x_nchw):
    p1, p2 = params["conv1"], params["conv2"]
    Cin = p1["w"].shape[2]
    C1 = p1["w"].shape[3]
    C2 = p2["w"].shape[3]

    x = jnp.transpose(x_nchw, (0, 2, 3, 1))                          # NCHW -> NHWC
    # Flatten HWIO weights once to (9*Cin, Cout) bf16 for the single im2col matmul.
    w1 = p1["w"].reshape(9 * Cin, C1).astype(jnp.bfloat16)
    w2 = p2["w"].reshape(9 * C1, C2).astype(jnp.bfloat16)

    y1, s1 = pool_conv_stats(x, w1)                                  # pool + conv1 (bf16)
    N, Ho, Wo, _ = y1.shape
    count = float(N * Ho * Wo)
    scale1, shift1 = _bn_fold(s1, p1["gamma"], p1["beta"], count)    # BN1 fold (plain JAX)
    y2, s2 = bn_relu_conv_stats(y1, scale1, shift1, w2)              # BN1+ReLU+conv2 (bf16)
    scale2, shift2 = _bn_fold(s2, p2["gamma"], p2["beta"], count)    # BN2 fold (plain JAX)
    out = bn_relu_finalize(y2, scale2, shift2)                       # BN2+ReLU (f32)
    return jnp.transpose(out, (0, 3, 1, 2))                          # NHWC -> NCHW


if __name__ == "__main__":
    key = jax.random.PRNGKey(0)
    kx, kp = jax.random.split(key)

    N, Cin, Hs, Ws = 2, 4, 16, 16
    Cout = 8

    x = jax.random.normal(kx, (N, Cin, Hs, Ws), jnp.float32)
    params = init_downsample_params(kp, Cin, Cout)

    fwd = jax.jit(downsample_forward)
    y = fwd(params, x)
    jax.block_until_ready(y)

    assert y.shape == (N, Cout, Hs // 2, Ws // 2), y.shape
    assert bool(jnp.all(jnp.isfinite(y)))
    assert bool(jnp.all(y >= 0.0))   # ReLU output
    print("KERNEL_OK")
</pallas_src>

<mosaic_0001>
module attributes {stable_mosaic.version = 11 : i64} {
  func.func @_pool_conv1_kernel(%arg0: i32, %arg1: memref<1x8x2x8x8xf32, #tpu.memory_space<vmem>>, %arg2: memref<36x8xbf16, #tpu.memory_space<vmem>>, %arg3: memref<1x8x8x8xbf16, #tpu.memory_space<vmem>>, %arg4: memref<1x2x8xf32, #tpu.memory_space<vmem>>, %arg5: memref<10x10x4xbf16, #tpu.memory_space<vmem>>) attributes {dimension_semantics = [#tpu.dimension_semantics<parallel>], iteration_bounds = array<i64: 2>, scalar_prefetch = 0 : i64, scratch_operands = 1 : i64, tpu.core_type = #tpu.core_type<tc>, window_params = [{transform_indices = @transform_0, window_bounds = array<i64: 1, 8, 2, 8, 8>}, {pipeline_mode = #tpu.pipeline_mode<synchronous>, transform_indices = @transform_1, window_bounds = array<i64: 36, 8>}, {transform_indices = @transform_2, window_bounds = array<i64: 1, 8, 8, 8>}, {transform_indices = @transform_3, window_bounds = array<i64: 1, 2, 8>}]} {
    %c0 = arith.constant 0 : index
    %c0_0 = arith.constant 0 : index
    %c0_1 = arith.constant 0 : index
    %c0_2 = arith.constant 0 : index
    %c0_3 = arith.constant 0 : index
    %0 = vector.load %arg1[%c0, %c0_0, %c0_1, %c0_2, %c0_3] : memref<1x8x2x8x8xf32, #tpu.memory_space<vmem>>, vector<1x8x2x8x8xf32>
    %1 = vector.shape_cast %0 : vector<1x8x2x8x8xf32> to vector<8x2x8x8xf32>
    %2 = vector.extract_strided_slice %1 {offsets = [0, 0, 0, 0], sizes = [8, 1, 8, 8], strides = [1, 1, 1, 1]} : vector<8x2x8x8xf32> to vector<8x1x8x8xf32>
    %3 = vector.shape_cast %2 : vector<8x1x8x8xf32> to vector<8x8x8xf32>
    %4 = vector.extract_strided_slice %1 {offsets = [0, 1, 0, 0], sizes = [8, 1, 8, 8], strides = [1, 1, 1, 1]} : vector<8x2x8x8xf32> to vector<8x1x8x8xf32>
    %5 = vector.shape_cast %4 : vector<8x1x8x8xf32> to vector<8x8x8xf32>
    %6 = arith.maximumf %3, %5 : vector<8x8x8xf32>
    %7 = vector.extract_strided_slice %6 {offsets = [0, 0, 0], sizes = [8, 8, 4], strides = [1, 1, 1]} : vector<8x8x8xf32> to vector<8x8x4xf32>
    %8 = vector.extract_strided_slice %6 {offsets = [0, 0, 4], sizes = [8, 8, 4], strides = [1, 1, 1]} : vector<8x8x8xf32> to vector<8x8x4xf32>
    %9 = arith.maximumf %7, %8 : vector<8x8x4xf32>
    %cst = arith.constant 0.000000e+00 : bf16
    %10 = vector.broadcast %cst : bf16 to vector<1x10x4xbf16>
    %c0_4 = arith.constant 0 : index
    %c0_5 = arith.constant 0 : index
    %c0_6 = arith.constant 0 : index
    %11 = vector.load %arg5[%c0_4, %c0_5, %c0_6] : memref<10x10x4xbf16, #tpu.memory_space<vmem>>, vector<1x10x4xbf16>
    tpu.vector_store %arg5[%c0_4, %c0_5, %c0_6], %10 {strides = array<i32>} : memref<10x10x4xbf16, #tpu.memory_space<vmem>>, vector<1x10x4xbf16>,
    %c9 = arith.constant 9 : index
    %c0_7 = arith.constant 0 : index
    %c0_8 = arith.constant 0 : index
    %12 = vector.load %arg5[%c9, %c0_7, %c0_8] : memref<10x10x4xbf16, #tpu.memory_space<vmem>>, vector<1x10x4xbf16>
    tpu.vector_store %arg5[%c9, %c0_7, %c0_8], %10 {strides = array<i32>} : memref<10x10x4xbf16, #tpu.memory_space<vmem>>, vector<1x10x4xbf16>,
    %cst_9 = arith.constant 0.000000e+00 : bf16
    %13 = vector.broadcast %cst_9 : bf16 to vector<10x1x4xbf16>
    %c0_10 = arith.constant 0 : index
    %c0_11 = arith.constant 0 : index
    %c0_12 = arith.constant 0 : index
    %14 = vector.load %arg5[%c0_10, %c0_11, %c0_12] : memref<10x10x4xbf16, #tpu.memory_space<vmem>>, vector<10x1x4xbf16>
    tpu.vector_store %arg5[%c0_10, %c0_11, %c0_12], %13 {strides = array<i32>} : memref<10x10x4xbf16, #tpu.memory_space<vmem>>, vector<10x1x4xbf16>,
    %c0_13 = arith.constant 0 : index
    %c9_14 = arith.constant 9 : index
    %c0_15 = arith.constant 0 : index
    %15 = vector.load %arg5[%c0_13, %c9_14, %c0_15] : memref<10x10x4xbf16, #tpu.memory_space<vmem>>, vector<10x1x4xbf16>
    tpu.vector_store %arg5[%c0_13, %c9_14, %c0_15], %13 {strides = array<i32>} : memref<10x10x4xbf16, #tpu.memory_space<vmem>>, vector<10x1x4xbf16>,
    %16 = arith.truncf %9 : vector<8x8x4xf32> to vector<8x8x4xbf16>
    %c1 = arith.constant 1 : index
    %c1_16 = arith.constant 1 : index
    %c0_17 = arith.constant 0 : index
    %17 = vector.load %arg5[%c1, %c1_16, %c0_17] : memref<10x10x4xbf16, #tpu.memory_space<vmem>>, vector<8x8x4xbf16>
    tpu.vector_store %arg5[%c1, %c1_16, %c0_17], %16 {strides = array<i32>} : memref<10x10x4xbf16, #tpu.memory_space<vmem>>, vector<8x8x4xbf16>,
    %c0_18 = arith.constant 0 : index
    %c0_19 = arith.constant 0 : index
    %c0_20 = arith.constant 0 : index
    %18 = vector.load %arg5[%c0_18, %c0_19, %c0_20] : memref<10x10x4xbf16, #tpu.memory_space<vmem>>, vector<10x8x4xbf16>
    %c0_21 = arith.constant 0 : index
    %c1_22 = arith.constant 1 : index
    %c0_23 = arith.constant 0 : index
    %19 = vector.load %arg5[%c0_21, %c1_22, %c0_23] : memref<10x10x4xbf16, #tpu.memory_space<vmem>>, vector<10x8x4xbf16>
    %c0_24 = arith.constant 0 : index
    %c2 = arith.constant 2 : index
    %c0_25 = arith.constant 0 : index
    %20 = vector.load %arg5[%c0_24, %c2, %c0_25] : memref<10x10x4xbf16, #tpu.memory_space<vmem>>, vector<10x8x4xbf16>
    %21 = tpu.concatenate %18, %19, %20 in 2 : vector<10x8x4xbf16>, vector<10x8x4xbf16>, vector<10x8x4xbf16> -> vector<10x8x12xbf16>
    %cst_26 = arith.constant 0.000000e+00 : f32
    %22 = vector.broadcast %cst_26 : f32 to vector<1x8xf32>
    %cst_27 = arith.constant 0.000000e+00 : f32
    %23 = vector.broadcast %cst_27 : f32 to vector<1x8xf32>
    %24 = vector.extract_strided_slice %21 {offsets = [0, 0, 0], sizes = [8, 8, 12], strides = [1, 1, 1]} : vector<10x8x12xbf16> to vector<8x8x12xbf16>
    %25 = vector.extract_strided_slice %21 {offsets = [1, 0, 0], sizes = [8, 8, 12], strides = [1, 1, 1]} : vector<10x8x12xbf16> to vector<8x8x12xbf16>
    %26 = vector.extract_strided_slice %21 {offsets = [2, 0, 0], sizes = [8, 8, 12], strides = [1, 1, 1]} : vector<10x8x12xbf16> to vector<8x8x12xbf16>
    %27 = tpu.concatenate %24, %25, %26 in 2 : vector<8x8x12xbf16>, vector<8x8x12xbf16>, vector<8x8x12xbf16> -> vector<8x8x36xbf16>
    %28 = vector.shape_cast %27 : vector<8x8x36xbf16> to vector<64x36xbf16>
    %c0_28 = arith.constant 0 : index
    %c0_29 = arith.constant 0 : index
    %29 = vector.load %arg2[%c0_28, %c0_29] : memref<36x8xbf16, #tpu.memory_space<vmem>>, vector<36x8xbf16>
    %cst_30 = arith.constant dense<0.000000e+00> : vector<64x8xf32>
    %30 = tpu.matmul %28, %29, %cst_30 {dimension_numbers = #tpu.dot_dimension_numbers<[1], [0], [0], [1], [0, 0, 1, 1], [], []>} : vector<64x36xbf16>, vector<36x8xbf16>, vector<64x8xf32> -> vector<64x8xf32>
    %cst_31 = arith.constant dense<0.000000e+00> : vector<8xf32>
    %31 = vector.multi_reduction <add>, %30, %cst_31 [0] : vector<64x8xf32> to vector<8xf32>
    %32 = vector.shape_cast %31 : vector<8xf32> to vector<1x8xf32>
    %33 = arith.addf %22, %32 : vector<1x8xf32>
    %34 = arith.mulf %30, %30 : vector<64x8xf32>
    %cst_32 = arith.constant dense<0.000000e+00> : vector<8xf32>
    %35 = vector.multi_reduction <add>, %34, %cst_32 [0] : vector<64x8xf32> to vector<8xf32>
    %36 = vector.shape_cast %35 : vector<8xf32> to vector<1x8xf32>
    %37 = arith.addf %23, %36 : vector<1x8xf32>
    %38 = vector.shape_cast %30 : vector<64x8xf32> to vector<8x8x8xf32>
    %39 = arith.truncf %38 : vector<8x8x8xf32> to vector<8x8x8xbf16>
    %c0_33 = arith.constant 0 : index
    %c0_34 = arith.constant 0 : index
    %c0_35 = arith.constant 0 : index
    %c0_36 = arith.constant 0 : index
    %40 = vector.load %arg3[%c0_33, %c0_34, %c0_35, %c0_36] : memref<1x8x8x8xbf16, #tpu.memory_space<vmem>>, vector<1x8x8x8xbf16>
    %41 = vector.shape_cast %40 : vector<1x8x8x8xbf16> to vector<8x8x8xbf16>
    %42 = vector.shape_cast %39 : vector<8x8x8xbf16> to vector<1x8x8x8xbf16>
    tpu.vector_store %arg3[%c0_33, %c0_34, %c0_35, %c0_36], %42 {strides = array<i32>} : memref<1x8x8x8xbf16, #tpu.memory_space<vmem>>, vector<1x8x8x8xbf16>,
    %c0_37 = arith.constant 0 : index
    %c0_38 = arith.constant 0 : index
    %c0_39 = arith.constant 0 : index
    %43 = vector.load %arg4[%c0_37, %c0_38, %c0_39] : memref<1x2x8xf32, #tpu.memory_space<vmem>>, vector<1x1x8xf32>
    %44 = vector.shape_cast %43 : vector<1x1x8xf32> to vector<1x8xf32>
    %45 = vector.shape_cast %33 : vector<1x8xf32> to vector<1x1x8xf32>
    tpu.vector_store %arg4[%c0_37, %c0_38, %c0_39], %45 {strides = array<i32>} : memref<1x2x8xf32, #tpu.memory_space<vmem>>, vector<1x1x8xf32>,
    %c0_40 = arith.constant 0 : index
    %c1_41 = arith.constant 1 : index
    %c0_42 = arith.constant 0 : index
    %46 = vector.load %arg4[%c0_40, %c1_41, %c0_42] : memref<1x2x8xf32, #tpu.memory_space<vmem>>, vector<1x1x8xf32>
    %47 = vector.shape_cast %46 : vector<1x1x8xf32> to vector<1x8xf32>
    %48 = vector.shape_cast %37 : vector<1x8xf32> to vector<1x1x8xf32>
    tpu.vector_store %arg4[%c0_40, %c1_41, %c0_42], %48 {strides = array<i32>} : memref<1x2x8xf32, #tpu.memory_space<vmem>>, vector<1x1x8xf32>,
    return
  }
  func.func @transform_0(%arg0: i32) -> (i32, i32, i32, i32, i32) {
    %c0_i32 = arith.constant 0 : i32
    %c0_i32_0 = arith.constant 0 : i32
    %c0_i32_1 = arith.constant 0 : i32
    %c0_i32_2 = arith.constant 0 : i32
    %c0_i32_3 = arith.constant 0 : i32
    return %arg0, %c0_i32, %c0_i32_0, %c0_i32_1, %c0_i32_2 : i32, i32, i32, i32, i32
  }
  func.func @transform_1(%arg0: i32) -> (i32, i32) {
    %c0_i32 = arith.constant 0 : i32
    %c0_i32_0 = arith.constant 0 : i32
    %c0_i32_1 = arith.constant 0 : i32
    return %c0_i32, %c0_i32_0 : i32, i32
  }
  func.func @transform_2(%arg0: i32) -> (i32, i32, i32, i32) {
    %c0_i32 = arith.constant 0 : i32
    %c0_i32_0 = arith.constant 0 : i32
    %c0_i32_1 = arith.constant 0 : i32
    %c0_i32_2 = arith.constant 0 : i32
    return %arg0, %c0_i32, %c0_i32_0, %c0_i32_1 : i32, i32, i32, i32
  }
  func.func @transform_3(%arg0: i32) -> (i32, i32, i32) {
    %c0_i32 = arith.constant 0 : i32
    %c0_i32_0 = arith.constant 0 : i32
    %c0_i32_1 = arith.constant 0 : i32
    return %arg0, %c0_i32, %c0_i32_0 : i32, i32, i32
  }
}

module attributes {stable_mosaic.version = 11 : i64} {
  func.func @_bn_relu_conv2_kernel(%arg0: i32, %arg1: memref<1x8x8x8xbf16, #tpu.memory_space<vmem>>, %arg2: memref<1x8xf32, #tpu.memory_space<vmem>>, %arg3: memref<1x8xf32, #tpu.memory_space<vmem>>, %arg4: memref<72x8xbf16, #tpu.memory_space<vmem>>, %arg5: memref<1x8x8x8xbf16, #tpu.memory_space<vmem>>, %arg6: memref<1x2x8xf32, #tpu.memory_space<vmem>>, %arg7: memref<10x10x8xbf16, #tpu.memory_space<vmem>>) attributes {dimension_semantics = [#tpu.dimension_semantics<parallel>], iteration_bounds = array<i64: 2>, scalar_prefetch = 0 : i64, scratch_operands = 1 : i64, tpu.core_type = #tpu.core_type<tc>, window_params = [{transform_indices = @transform_0, window_bounds = array<i64: 1, 8, 8, 8>}, {pipeline_mode = #tpu.pipeline_mode<synchronous>, transform_indices = @transform_1, window_bounds = array<i64: 1, 8>}, {pipeline_mode = #tpu.pipeline_mode<synchronous>, transform_indices = @transform_2, window_bounds = array<i64: 1, 8>}, {pipeline_mode = #tpu.pipeline_mode<synchronous>, transform_indices = @transform_3, window_bounds = array<i64: 72, 8>}, {transform_indices = @transform_4, window_bounds = array<i64: 1, 8, 8, 8>}, {transform_indices = @transform_5, window_bounds = array<i64: 1, 2, 8>}]} {
    %c0 = arith.constant 0 : index
    %c0_0 = arith.constant 0 : index
    %c0_1 = arith.constant 0 : index
    %c0_2 = arith.constant 0 : index
    %0 = vector.load %arg1[%c0, %c0_0, %c0_1, %c0_2] : memref<1x8x8x8xbf16, #tpu.memory_space<vmem>>, vector<1x8x8x8xbf16>
    %1 = vector.shape_cast %0 : vector<1x8x8x8xbf16> to vector<8x8x8xbf16>
    %2 = arith.extf %1 : vector<8x8x8xbf16> to vector<8x8x8xf32>
    %c0_3 = arith.constant 0 : index
    %c0_4 = arith.constant 0 : index
    %3 = vector.load %arg2[%c0_3, %c0_4] : memref<1x8xf32, #tpu.memory_space<vmem>>, vector<1x8xf32>
    %4 = vector.shape_cast %3 : vector<1x8xf32> to vector<1x1x8xf32>
    %5 = vector.broadcast %4 : vector<1x1x8xf32> to vector<8x8x8xf32>
    %6 = arith.mulf %2, %5 : vector<8x8x8xf32>
    %c0_5 = arith.constant 0 : index
    %c0_6 = arith.constant 0 : index
    %7 = vector.load %arg3[%c0_5, %c0_6] : memref<1x8xf32, #tpu.memory_space<vmem>>, vector<1x8xf32>
    %8 = vector.shape_cast %7 : vector<1x8xf32> to vector<1x1x8xf32>
    %9 = vector.broadcast %8 : vector<1x1x8xf32> to vector<8x8x8xf32>
    %10 = arith.addf %6, %9 : vector<8x8x8xf32>
    %cst = arith.constant 0.000000e+00 : f32
    %11 = vector.broadcast %cst : f32 to vector<8x8x8xf32>
    %12 = arith.maximumf %10, %11 : vector<8x8x8xf32>
    %cst_7 = arith.constant 0.000000e+00 : bf16
    %13 = vector.broadcast %cst_7 : bf16 to vector<1x10x8xbf16>
    %c0_8 = arith.constant 0 : index
    %c0_9 = arith.constant 0 : index
    %c0_10 = arith.constant 0 : index
    %14 = vector.load %arg7[%c0_8, %c0_9, %c0_10] : memref<10x10x8xbf16, #tpu.memory_space<vmem>>, vector<1x10x8xbf16>
    tpu.vector_store %arg7[%c0_8, %c0_9, %c0_10], %13 {strides = array<i32>} : memref<10x10x8xbf16, #tpu.memory_space<vmem>>, vector<1x10x8xbf16>,
    %c9 = arith.constant 9 : index
    %c0_11 = arith.constant 0 : index
    %c0_12 = arith.constant 0 : index
    %15 = vector.load %arg7[%c9, %c0_11, %c0_12] : memref<10x10x8xbf16, #tpu.memory_space<vmem>>, vector<1x10x8xbf16>
    tpu.vector_store %arg7[%c9, %c0_11, %c0_12], %13 {strides = array<i32>} : memref<10x10x8xbf16, #tpu.memory_space<vmem>>, vector<1x10x8xbf16>,
    %cst_13 = arith.constant 0.000000e+00 : bf16
    %16 = vector.broadcast %cst_13 : bf16 to vector<10x1x8xbf16>
    %c0_14 = arith.constant 0 : index
    %c0_15 = arith.constant 0 : index
    %c0_16 = arith.constant 0 : index
    %17 = vector.load %arg7[%c0_14, %c0_15, %c0_16] : memref<10x10x8xbf16, #tpu.memory_space<vmem>>, vector<10x1x8xbf16>
    tpu.vector_store %arg7[%c0_14, %c0_15, %c0_16], %16 {strides = array<i32>} : memref<10x10x8xbf16, #tpu.memory_space<vmem>>, vector<10x1x8xbf16>,
    %c0_17 = arith.constant 0 : index
    %c9_18 = arith.constant 9 : index
    %c0_19 = arith.constant 0 : index
    %18 = vector.load %arg7[%c0_17, %c9_18, %c0_19] : memref<10x10x8xbf16, #tpu.memory_space<vmem>>, vector<10x1x8xbf16>
    tpu.vector_store %arg7[%c0_17, %c9_18, %c0_19], %16 {strides = array<i32>} : memref<10x10x8xbf16, #tpu.memory_space<vmem>>, vector<10x1x8xbf16>,
    %19 = arith.truncf %12 : vector<8x8x8xf32> to vector<8x8x8xbf16>
    %c1 = arith.constant 1 : index
    %c1_20 = arith.constant 1 : index
    %c0_21 = arith.constant 0 : index
    %20 = vector.load %arg7[%c1, %c1_20, %c0_21] : memref<10x10x8xbf16, #tpu.memory_space<vmem>>, vector<8x8x8xbf16>
    tpu.vector_store %arg7[%c1, %c1_20, %c0_21], %19 {strides = array<i32>} : memref<10x10x8xbf16, #tpu.memory_space<vmem>>, vector<8x8x8xbf16>,
    %c0_22 = arith.constant 0 : index
    %c0_23 = arith.constant 0 : index
    %c0_24 = arith.constant 0 : index
    %21 = vector.load %arg7[%c0_22, %c0_23, %c0_24] : memref<10x10x8xbf16, #tpu.memory_space<vmem>>, vector<10x8x8xbf16>
    %c0_25 = arith.constant 0 : index
    %c1_26 = arith.constant 1 : index
    %c0_27 = arith.constant 0 : index
    %22 = vector.load %arg7[%c0_25, %c1_26, %c0_27] : memref<10x10x8xbf16, #tpu.memory_space<vmem>>, vector<10x8x8xbf16>
    %c0_28 = arith.constant 0 : index
    %c2 = arith.constant 2 : index
    %c0_29 = arith.constant 0 : index
    %23 = vector.load %arg7[%c0_28, %c2, %c0_29] : memref<10x10x8xbf16, #tpu.memory_space<vmem>>, vector<10x8x8xbf16>
    %24 = tpu.concatenate %21, %22, %23 in 2 : vector<10x8x8xbf16>, vector<10x8x8xbf16>, vector<10x8x8xbf16> -> vector<10x8x24xbf16>
    %cst_30 = arith.constant 0.000000e+00 : f32
    %25 = vector.broadcast %cst_30 : f32 to vector<1x8xf32>
    %cst_31 = arith.constant 0.000000e+00 : f32
    %26 = vector.broadcast %cst_31 : f32 to vector<1x8xf32>
    %27 = vector.extract_strided_slice %24 {offsets = [0, 0, 0], sizes = [8, 8, 24], strides = [1, 1, 1]} : vector<10x8x24xbf16> to vector<8x8x24xbf16>
    %28 = vector.extract_strided_slice %24 {offsets = [1, 0, 0], sizes = [8, 8, 24], strides = [1, 1, 1]} : vector<10x8x24xbf16> to vector<8x8x24xbf16>
    %29 = vector.extract_strided_slice %24 {offsets = [2, 0, 0], sizes = [8, 8, 24], strides = [1, 1, 1]} : vector<10x8x24xbf16> to vector<8x8x24xbf16>
    %30 = tpu.concatenate %27, %28, %29 in 2 : vector<8x8x24xbf16>, vector<8x8x24xbf16>, vector<8x8x24xbf16> -> vector<8x8x72xbf16>
    %31 = vector.shape_cast %30 : vector<8x8x72xbf16> to vector<64x72xbf16>
    %c0_32 = arith.constant 0 : index
    %c0_33 = arith.constant 0 : index
    %32 = vector.load %arg4[%c0_32, %c0_33] : memref<72x8xbf16, #tpu.memory_space<vmem>>, vector<72x8xbf16>
    %cst_34 = arith.constant dense<0.000000e+00> : vector<64x8xf32>
    %33 = tpu.matmul %31, %32, %cst_34 {dimension_numbers = #tpu.dot_dimension_numbers<[1], [0], [0], [1], [0, 0, 1, 1], [], []>} : vector<64x72xbf16>, vector<72x8xbf16>, vector<64x8xf32> -> vector<64x8xf32>
    %cst_35 = arith.constant dense<0.000000e+00> : vector<8xf32>
    %34 = vector.multi_reduction <add>, %33, %cst_35 [0] : vector<64x8xf32> to vector<8xf32>
    %35 = vector.shape_cast %34 : vector<8xf32> to vector<1x8xf32>
    %36 = arith.addf %25, %35 : vector<1x8xf32>
    %37 = arith.mulf %33, %33 : vector<64x8xf32>
    %cst_36 = arith.constant dense<0.000000e+00> : vector<8xf32>
    %38 = vector.multi_reduction <add>, %37, %cst_36 [0] : vector<64x8xf32> to vector<8xf32>
    %39 = vector.shape_cast %38 : vector<8xf32> to vector<1x8xf32>
    %40 = arith.addf %26, %39 : vector<1x8xf32>
    %41 = vector.shape_cast %33 : vector<64x8xf32> to vector<8x8x8xf32>
    %42 = arith.truncf %41 : vector<8x8x8xf32> to vector<8x8x8xbf16>
    %c0_37 = arith.constant 0 : index
    %c0_38 = arith.constant 0 : index
    %c0_39 = arith.constant 0 : index
    %c0_40 = arith.constant 0 : index
    %43 = vector.load %arg5[%c0_37, %c0_38, %c0_39, %c0_40] : memref<1x8x8x8xbf16, #tpu.memory_space<vmem>>, vector<1x8x8x8xbf16>
    %44 = vector.shape_cast %43 : vector<1x8x8x8xbf16> to vector<8x8x8xbf16>
    %45 = vector.shape_cast %42 : vector<8x8x8xbf16> to vector<1x8x8x8xbf16>
    tpu.vector_store %arg5[%c0_37, %c0_38, %c0_39, %c0_40], %45 {strides = array<i32>} : memref<1x8x8x8xbf16, #tpu.memory_space<vmem>>, vector<1x8x8x8xbf16>,
    %c0_41 = arith.constant 0 : index
    %c0_42 = arith.constant 0 : index
    %c0_43 = arith.constant 0 : index
    %46 = vector.load %arg6[%c0_41, %c0_42, %c0_43] : memref<1x2x8xf32, #tpu.memory_space<vmem>>, vector<1x1x8xf32>
    %47 = vector.shape_cast %46 : vector<1x1x8xf32> to vector<1x8xf32>
    %48 = vector.shape_cast %36 : vector<1x8xf32> to vector<1x1x8xf32>
    tpu.vector_store %arg6[%c0_41, %c0_42, %c0_43], %48 {strides = array<i32>} : memref<1x2x8xf32, #tpu.memory_space<vmem>>, vector<1x1x8xf32>,
    %c0_44 = arith.constant 0 : index
    %c1_45 = arith.constant 1 : index
    %c0_46 = arith.constant 0 : index
    %49 = vector.load %arg6[%c0_44, %c1_45, %c0_46] : memref<1x2x8xf32, #tpu.memory_space<vmem>>, vector<1x1x8xf32>
    %50 = vector.shape_cast %49 : vector<1x1x8xf32> to vector<1x8xf32>
    %51 = vector.shape_cast %40 : vector<1x8xf32> to vector<1x1x8xf32>
    tpu.vector_store %arg6[%c0_44, %c1_45, %c0_46], %51 {strides = array<i32>} : memref<1x2x8xf32, #tpu.memory_space<vmem>>, vector<1x1x8xf32>,
    return
  }
  func.func @transform_0(%arg0: i32) -> (i32, i32, i32, i32) {
    %c0_i32 = arith.constant 0 : i32
    %c0_i32_0 = arith.constant 0 : i32
    %c0_i32_1 = arith.constant 0 : i32
    %c0_i32_2 = arith.constant 0 : i32
    return %arg0, %c0_i32, %c0_i32_0, %c0_i32_1 : i32, i32, i32, i32
  }
  func.func @transform_1(%arg0: i32) -> (i32, i32) {
    %c0_i32 = arith.constant 0 : i32
    %c0_i32_0 = arith.constant 0 : i32
    %c0_i32_1 = arith.constant 0 : i32
    return %c0_i32, %c0_i32_0 : i32, i32
  }
  func.func @transform_2(%arg0: i32) -> (i32, i32) {
    %c0_i32 = arith.constant 0 : i32
    %c0_i32_0 = arith.constant 0 : i32
    %c0_i32_1 = arith.constant 0 : i32
    return %c0_i32, %c0_i32_0 : i32, i32
  }
  func.func @transform_3(%arg0: i32) -> (i32, i32) {
    %c0_i32 = arith.constant 0 : i32
    %c0_i32_0 = arith.constant 0 : i32
    %c0_i32_1 = arith.constant 0 : i32
    return %c0_i32, %c0_i32_0 : i32, i32
  }
  func.func @transform_4(%arg0: i32) -> (i32, i32, i32, i32) {
    %c0_i32 = arith.constant 0 : i32
    %c0_i32_0 = arith.constant 0 : i32
    %c0_i32_1 = arith.constant 0 : i32
    %c0_i32_2 = arith.constant 0 : i32
    return %arg0, %c0_i32, %c0_i32_0, %c0_i32_1 : i32, i32, i32, i32
  }
  func.func @transform_5(%arg0: i32) -> (i32, i32, i32) {
    %c0_i32 = arith.constant 0 : i32
    %c0_i32_0 = arith.constant 0 : i32
    %c0_i32_1 = arith.constant 0 : i32
    return %arg0, %c0_i32, %c0_i32_0 : i32, i32, i32
  }
}

module attributes {stable_mosaic.version = 11 : i64} {
  func.func @_bn_relu_out_kernel(%arg0: i32, %arg1: memref<2x512xbf16, #tpu.memory_space<vmem>>, %arg2: memref<1x512xf32, #tpu.memory_space<vmem>>, %arg3: memref<1x512xf32, #tpu.memory_space<vmem>>, %arg4: memref<2x512xf32, #tpu.memory_space<vmem>>) attributes {dimension_semantics = [#tpu.dimension_semantics<parallel>], iteration_bounds = array<i64: 1>, scalar_prefetch = 0 : i64, scratch_operands = 0 : i64, tpu.core_type = #tpu.core_type<tc>, window_params = [{transform_indices = @transform_0, window_bounds = array<i64: 2, 512>}, {pipeline_mode = #tpu.pipeline_mode<synchronous>, transform_indices = @transform_1, window_bounds = array<i64: 1, 512>}, {pipeline_mode = #tpu.pipeline_mode<synchronous>, transform_indices = @transform_2, window_bounds = array<i64: 1, 512>}, {transform_indices = @transform_3, window_bounds = array<i64: 2, 512>}]} {
    %c0 = arith.constant 0 : index
    %c0_0 = arith.constant 0 : index
    %0 = vector.load %arg1[%c0, %c0_0] : memref<2x512xbf16, #tpu.memory_space<vmem>>, vector<2x512xbf16>
    %1 = arith.extf %0 : vector<2x512xbf16> to vector<2x512xf32>
    %c0_1 = arith.constant 0 : index
    %c0_2 = arith.constant 0 : index
    %2 = vector.load %arg2[%c0_1, %c0_2] : memref<1x512xf32, #tpu.memory_space<vmem>>, vector<1x512xf32>
    %3 = vector.broadcast %2 : vector<1x512xf32> to vector<2x512xf32>
    %4 = arith.mulf %1, %3 : vector<2x512xf32>
    %c0_3 = arith.constant 0 : index
    %c0_4 = arith.constant 0 : index
    %5 = vector.load %arg3[%c0_3, %c0_4] : memref<1x512xf32, #tpu.memory_space<vmem>>, vector<1x512xf32>
    %6 = vector.broadcast %5 : vector<1x512xf32> to vector<2x512xf32>
    %7 = arith.addf %4, %6 : vector<2x512xf32>
    %cst = arith.constant 0.000000e+00 : f32
    %8 = vector.broadcast %cst : f32 to vector<2x512xf32>
    %9 = arith.maximumf %7, %8 : vector<2x512xf32>
    %c0_5 = arith.constant 0 : index
    %c0_6 = arith.constant 0 : index
    %10 = vector.load %arg4[%c0_5, %c0_6] : memref<2x512xf32, #tpu.memory_space<vmem>>, vector<2x512xf32>
    tpu.vector_store %arg4[%c0_5, %c0_6], %9 {strides = array<i32>} : memref<2x512xf32, #tpu.memory_space<vmem>>, vector<2x512xf32>,
    return
  }
  func.func @transform_0(%arg0: i32) -> (i32, i32) {
    %c0_i32 = arith.constant 0 : i32
    %c0_i32_0 = arith.constant 0 : i32
    return %arg0, %c0_i32 : i32, i32
  }
  func.func @transform_1(%arg0: i32) -> (i32, i32) {
    %c0_i32 = arith.constant 0 : i32
    %c0_i32_0 = arith.constant 0 : i32
    %c0_i32_1 = arith.constant 0 : i32
    return %c0_i32, %c0_i32_0 : i32, i32
  }
  func.func @transform_2(%arg0: i32) -> (i32, i32) {
    %c0_i32 = arith.constant 0 : i32
    %c0_i32_0 = arith.constant 0 : i32
    %c0_i32_1 = arith.constant 0 : i32
    return %c0_i32, %c0_i32_0 : i32, i32
  }
  func.func @transform_3(%arg0: i32) -> (i32, i32) {
    %c0_i32 = arith.constant 0 : i32
    %c0_i32_0 = arith.constant 0 : i32
    return %arg0, %c0_i32 : i32, i32
  }
}

</mosaic_0001>

<bundles_post_ra>
// kernel: tile.13
= control target key start
LH: loop header
LB: loop body
LE: loop exit
PB: predicated region body
PF: predicated region fallthrough
CT: control target
= control target key end

     0   :  { %s64_s0 = inlined_call_operand.vmem [shape: f32[8], index: 0, kind: input, shape index: {}]   ;;  %s65_s1 = inlined_call_operand.vmem [shape: f32[64,8], index: 1, kind: output, shape index: {}]  }
   0x1   :  { %v4_v0 = vld [vmem:[%s64_s0] ss:$0 sm:$0xff] }
   0x2   :  { %5 = vst [vmem:[%s65_s1] sm:$0xff] %v4_v0  ;;  %20 = vst [vmem:[%s65_s1 + $0x8] sm:$0xff] %v4_v0 }
   0x3   :  { %21 = vst [vmem:[%s65_s1 + $0x10] sm:$0xff] %v4_v0  ;;  %22 = vst [vmem:[%s65_s1 + $0x18] sm:$0xff] %v4_v0 }
   0x4   :  { %23 = vst [vmem:[%s65_s1 + $0x20] sm:$0xff] %v4_v0  ;;  %24 = vst [vmem:[%s65_s1 + $0x28] sm:$0xff] %v4_v0 }
   0x5   :  { %25 = vst [vmem:[%s65_s1 + $0x30] sm:$0xff] %v4_v0  ;;  %26 = vst [vmem:[%s65_s1 + $0x38] sm:$0xff] %v4_v0 }

// kernel: tile.14
= control target key start
LH: loop header
LB: loop body
LE: loop exit
PB: predicated region body
PF: predicated region fallthrough
CT: control target
= control target key end

     0   :  { %vm6_vm0 = vcmask 1043458   ;;  %s11_s6 = smov 3  ;;  %s14_s7 = smov 12  ;;  %vm8_vm1 = vcmask 64512   ;;  %vm20_vm2 = vcmask 1048512   ;;  %vm32_vm3 = vcmask 982912   ;;  %s412_s0 = inlined_call_operand.vmem [shape: f32[64,8], index: 0, kind: input, shape index: {}]   ;;  %s413_s1 = inlined_call_operand.vmem [shape: f32[1,512], index: 1, kind: output, shape index: {}]  }
   0x1   :  { %v215_v0 = vld [vmem:[%s412_s0 + $0xf] ss:$16 sm:%s11_s6]   ;;  %s35_s12 = smov 3  ;;  %s38_s15 = smov 12  ;;  %vm44_vm4 = vcmask 917312   ;;  %vm56_vm5 = vcmask 851712  }
   0x2   :  { %v216_v1 = vld [vmem:[%s412_s0 + $0xf] ss:$16 sm:%s14_s7]   ;;  %v219_v3 = vld [vmem:[%s412_s0 + $0xd] ss:$16 sm:%s35_s12]   ;;  %s263_s16 = smov 120   ;;  %s23_s19 = smov 3 }
   0x3   :  { %v17_v2 = vsel %vm6_vm0, %v216_v1, %v215_v0  ;;  %v220_v4 = vld [vmem:[%s412_s0 + $0xd] ss:$16 sm:%s38_s15]   ;;  %s26_s20 = smov 12  ;;  %v217_v6 = vld [vmem:[%s412_s0 + $0xe] ss:$16 sm:%s23_s19]   ;;  %s47_s25 = smov 3 }
   0x4   :  { %18 = vrot.lane.b32.xlu0 %v17_v2, %s263_s16  ;;  %v41_v5 = vsel %vm6_vm0, %v220_v4, %v219_v3  ;;  %v218_v7 = vld [vmem:[%s412_s0 + $0xe] ss:$16 sm:%s26_s20]   ;;  %s264_s26 = smov 104   ;;  %s50_s29 = smov 12  ;;  %vm68_vm6 = vcmask 786112   ;;  %vm80_vm7 = vcmask 720512  }
   0x5   :  { %42 = vrot.lane.b32.xlu1 %v41_v5, %s264_s26  ;;  %v29_v8 = vsel %vm6_vm0, %v218_v7, %v217_v6  ;;  %v221_v9 = vld [vmem:[%s412_s0 + $0xc] ss:$16 sm:%s47_s25]   ;;  %s59_s3 = smov 3  ;;  %s62_s4 = smov 12  ;;  %vm92_vm8 = vcmask 654912   ;;  %vm104_vm9 = vcmask 589312  }
   0x6   :  { %v222_v10 = vld [vmem:[%s412_s0 + $0xc] ss:$16 sm:%s50_s29]   ;;  %s265_s5 = smov 112   ;;  %v223_v12 = vld [vmem:[%s412_s0 + $0xb] ss:$16 sm:%s59_s3]   ;;  %s71_s8 = smov 3 }
   0x7   :  { %v53_v11 = vsel %vm6_vm0, %v222_v10, %v221_v9  ;;  %v224_v13 = vld [vmem:[%s412_s0 + $0xb] ss:$16 sm:%s62_s4]   ;;  %v225_v14 = vld [vmem:[%s412_s0 + $0xa] ss:$16 sm:%s71_s8]   ;;  %s74_s13 = smov 12  ;;  %s266_s14 = smov 96  }
   0x8   :  { %30 = vrot.lane.b32.xlu0 %v29_v8, %s265_s5  ;;  %v65_v15 = vsel %vm6_vm0, %v224_v13, %v223_v12  ;;  %v226_v16 = vld [vmem:[%s412_s0 + $0xa] ss:$16 sm:%s74_s13]   ;;  %s83_s17 = smov 3  ;;  %s86_s18 = smov 12  ;;  %vm116_vm10 = vcmask 523712   ;;  %vm128_vm11 = vcmask 458112  }
   0x9   :  { %54 = vrot.lane.b32.xlu1 %v53_v11, %s266_s14  ;;  %v77_v17 = vsel %vm6_vm0, %v226_v16, %v225_v14  ;;  %v227_v18 = vld [vmem:[%s412_s0 + $0x9] ss:$16 sm:%s83_s17]   ;;  %s95_s23 = smov 3  ;;  %s267_s24 = smov 88   ;;  %vm140_vm12 = vcmask 392512   ;;  %vm152_vm13 = vcmask 326912  }
   0xa   :  { %v228_v19 = vld [vmem:[%s412_s0 + $0x9] ss:$16 sm:%s86_s18]   ;;  %v229_v20 = vld [vmem:[%s412_s0 + $0x8] ss:$16 sm:%s95_s23]   ;;  %s98_s27 = smov 12  ;;  %s107_s30 = smov 3 }
   0xb   :  { %v89_v21 = vsel %vm6_vm0, %v228_v19, %v227_v18  ;;  %v230_v22 = vld [vmem:[%s412_s0 + $0x8] ss:$16 sm:%s98_s27]   ;;  %s110_s2 = smov 12  ;;  %s268_s3 = smov 80   ;;  %v231_v23 = vld [vmem:[%s412_s0 + $0x7] ss:$16 sm:%s107_s30]  }
   0xc   :  { %66 = vrot.lane.b32.xlu0 %v65_v15, %s267_s24  ;;  %s119_s6 = smov 3  ;;  %v101_v24 = vsel %vm6_vm0, %v230_v22, %v229_v20  ;;  %v232_v25 = vld [vmem:[%s412_s0 + $0x7] ss:$16 sm:%s110_s2]   ;;  %s122_s11 = smov 12  ;;  %vm164_vm14 = vcmask 261312   ;;  %vm176_vm15 = vcmask 195712  }
   0xd   :  { %78 = vrot.lane.b32.xlu1 %v77_v17, %s268_s3  ;;  %v233_v26 = vld [vmem:[%s412_s0 + $0x6] ss:$16 sm:%s119_s6]   ;;  %s269_s12 = smov 72   ;;  %s131_s15 = smov 3  ;;  %v113_v28 = vsel %vm6_vm0, %v232_v25, %v231_v23 }
   0xe   :  { %v234_v27 = vld [vmem:[%s412_s0 + $0x6] ss:$16 sm:%s122_s11]   ;;  %s134_s16 = smov 12  ;;  %v235_v29 = vld [vmem:[%s412_s0 + $0x5] ss:$16 sm:%s131_s15]   ;;  %s143_s19 = smov 3 }
   0xf   :  { %s270_s20 = smov 64   ;;  %v236_v30 = vld [vmem:[%s412_s0 + $0x5] ss:$16 sm:%s134_s16]   ;;  %s146_s23 = smov 12  ;;  %v125_v31 = vsel %vm6_vm0, %v234_v27, %v233_v26  ;;  %v237_v32 = vld [vmem:[%s412_s0 + $0x4] ss:$16 sm:%s143_s19]  }
  0x10   :  { %90 = vrot.lane.b32.xlu0 %v89_v21, %s269_s12  ;;  %s155_s26 = smov 3  ;;  %s158_s27 = smov 12  ;;  %v238_v33 = vld [vmem:[%s412_s0 + $0x4] ss:$16 sm:%s146_s23]   ;;  %v137_v34 = vsel %vm6_vm0, %v236_v30, %v235_v29 }
  0x11   :  { %102 = vrot.lane.b32.xlu1 %v101_v24, %s270_s20  ;;  %s271_s28 = smov 56   ;;  %s167_s2 = smov 3  ;;  %v239_v35 = vld [vmem:[%s412_s0 + $0x3] ss:$16 sm:%s155_s26]   ;;  %v149_v37 = vsel %vm6_vm0, %v238_v33, %v237_v32 }
  0x12   :  { %s170_s5 = smov 12  ;;  %s272_s6 = smov 48   ;;  %v240_v36 = vld [vmem:[%s412_s0 + $0x3] ss:$16 sm:%s158_s27]   ;;  %v241_v38 = vld [vmem:[%s412_s0 + $0x2] ss:$16 sm:%s167_s2]  }
  0x13   :  { %s179_s9 = smov 3  ;;  %v242_v39 = vld [vmem:[%s412_s0 + $0x2] ss:$16 sm:%s170_s5]   ;;  %s182_s14 = smov 12  ;;  %v161_v41 = vsel %vm6_vm0, %v240_v36, %v239_v35 }
  0x14   :  { %114 = vrot.lane.b32.xlu0 %v113_v28, %s271_s28  ;;  %s2_s15 = smov 3  ;;  %s273_s16 = smov 40   ;;  %v243_v42 = vld [vmem:[%s412_s0 + $0x1] ss:$16 sm:%s179_s9]   ;;  %v173_v46 = vsel %vm6_vm0, %v242_v39, %v241_v38 }
  0x15   :  { %126 = vrot.lane.b32.xlu1 %v125_v31, %s272_s6  ;;  %v3_v40 = vld [vmem:[%s412_s0] ss:$16 sm:%s2_s15]   ;;  %s4_s19 = smov 12  ;;  %s274_s24 = smov 32  }
  0x16   :  { %v5_v43 = vld [vmem:[%s412_s0] ss:$16 sm:%s4_s19]   ;;  %v244_v44 = vld [vmem:[%s412_s0 + $0x1] ss:$16 sm:%s182_s14]   ;;  %s275_s0 = smov 24   ;;  %s276_s27 = smov 16  }
  0x17   :  { %v7_v45 = vsel %vm6_vm0, %v5_v43, %v3_v40  ;;  %v185_v47 = vsel %vm6_vm0, %v244_v44, %v243_v42  ;;  %s277_s28 = smov 8   ;;  %vm188_vm0 = vcmask 130112  }
  0x18   :  { %138 = vrot.lane.b32.xlu0 %v137_v34, %s273_s16  ;;  %9 = vst.msk [vmem:[#allocation0] ss:$8 sm:$0xf] %vm8_vm1, %v7_v45  }
  0x19   :  { %150 = vrot.lane.b32.xlu1 %v149_v37, %s274_s24 }
  0x1c   :  { %162 = vrot.lane.b32.xlu0 %v161_v41, %s275_s0 }
  0x1d   :  { %174 = vrot.lane.b32.xlu1 %v173_v46, %s276_s27 }
  0x20   :  { %186 = vrot.lane.b32.xlu0 %v185_v47, %s277_s28 }
  0x76   :  { %v19_v48 = vpop.permute.xlu0 %18  }
  0x77   :  { %21 = vst.msk [vmem:[#allocation0] ss:$8 sm:$0xf] %vm20_vm2, %v19_v48   ;;  %v43_v49 = vpop.permute.xlu1 %42  }
  0x7a   :  { %v31_v50 = vpop.permute.xlu0 %30  }
  0x7b   :  { %33 = vst.msk [vmem:[#allocation0] ss:$8 sm:$0xf] %vm32_vm3, %v31_v50   ;;  %v55_v51 = vpop.permute.xlu1 %54  }
  0x7c   :  { %45 = vst.msk [vmem:[#allocation0] ss:$8 sm:$0xf] %vm44_vm4, %v43_v49  }
  0x7d   :  { %57 = vst.msk [vmem:[#allocation0] ss:$8 sm:$0xf] %vm56_vm5, %v55_v51  }
  0x7e   :  { %v67_v52 = vpop.permute.xlu0 %66  }
  0x7f   :  { %69 = vst.msk [vmem:[#allocation0] ss:$8 sm:$0xf] %vm68_vm6, %v67_v52   ;;  %v79_v53 = vpop.permute.xlu1 %78  }
  0x80   :  { %81 = vst.msk [vmem:[#allocation0] ss:$8 sm:$0xf] %vm80_vm7, %v79_v53  }
  0x82   :  { %v91_v54 = vpop.permute.xlu0 %90  }
  0x83   :  { %93 = vst.msk [vmem:[#allocation0] ss:$8 sm:$0xf] %vm92_vm8, %v91_v54   ;;  %v103_v55 = vpop.permute.xlu1 %102  }
  0x84   :  { %105 = vst.msk [vmem:[#allocation0] ss:$8 sm:$0xf] %vm104_vm9, %v103_v55  }
  0x86   :  { %v115_v56 = vpop.permute.xlu0 %114  }
  0x87   :  { %117 = vst.msk [vmem:[#allocation0] ss:$8 sm:$0xf] %vm116_vm10, %v115_v56   ;;  %v127_v57 = vpop.permute.xlu1 %126  }
  0x88   :  { %129 = vst.msk [vmem:[#allocation0] ss:$8 sm:$0xf] %vm128_vm11, %v127_v57  }
  0x8a   :  { %v139_v58 = vpop.permute.xlu0 %138  }
  0x8b   :  { %141 = vst.msk [vmem:[#allocation0] ss:$8 sm:$0xf] %vm140_vm12, %v139_v58   ;;  %v151_v59 = vpop.permute.xlu1 %150  }
  0x8c   :  { %153 = vst.msk [vmem:[#allocation0] ss:$8 sm:$0xf] %vm152_vm13, %v151_v59  }
  0x8e   :  { %v163_v60 = vpop.permute.xlu0 %162  }
  0x8f   :  { %165 = vst.msk [vmem:[#allocation0] ss:$8 sm:$0xf] %vm164_vm14, %v163_v60   ;;  %v175_v61 = vpop.permute.xlu1 %174  }
  0x90   :  { %177 = vst.msk [vmem:[#allocation0] ss:$8 sm:$0xf] %vm176_vm15, %v175_v61  }
  0x92   :  { %v187_v62 = vpop.permute.xlu0 %186  }
  0x93   :  { %189 = vst.msk [vmem:[#allocation0] ss:$8 sm:$0xf] %vm188_vm0, %v187_v62  }
  0x9a   :  { %v193_v63 = vld [vmem:[#allocation0] sm:$0x1]  ;;  %v197_v0 = vld [vmem:[#allocation0 + $0x8] sm:$0x1]  ;;  %v202_v1 = vld [vmem:[#allocation0 + $0x10] sm:$0x1] }
  0x9b   :  { %195 = vst [vmem:[%s413_s1] sm:$0x1] %v193_v63  ;;  %245 = vst [vmem:[%s413_s1 + $0x1] sm:$0x1] %v197_v0  ;;  %v208_v2 = vld [vmem:[#allocation0 + $0x18] sm:$0x1] }
  0x9c   :  { %246 = vst [vmem:[%s413_s1 + $0x2] sm:$0x1] %v202_v1  ;;  %247 = vst [vmem:[%s413_s1 + $0x3] sm:$0x1] %v208_v2 }

// kernel: downsample_forward.5
= control target key start
LH: loop header
LB: loop body
LE: loop exit
PB: predicated region body
PF: predicated region fallthrough
CT: control target
= control target key end

     0   :  { %v18_v0 = vlaneseq  ;;  %v97_v1 = vmov 1983009808   ;;  %s130_s1 = inlined_call_operand.vmem [shape: f32[1,512], index: 1, kind: input, shape index: {}]   ;;  %s131_s2 = inlined_call_operand.vmem [shape: f32[1,512], index: 2, kind: input, shape index: {}]   ;;  %s132_s0 = inlined_call_operand.vmem [shape: bf16[2,512], index: 0, kind: input, shape index: {}]   ;;  %s133_s3 = inlined_call_operand.vmem [shape: f32[2,512], index: 3, kind: output, shape index: {}]  }
   0x1   :  { %v37_v2 = vunpack.c.l.s4 %v97_v1  ;;  %v16_v4 = vld [vmem:[%s130_s1] sm:$0xf] }
   0x2   :  { %v19_v3 = vshrl.u32 %v18_v0, 7  ;;  %v53_v10 = vld [vmem:[%s131_s2] sm:$0xf] }
   0x3   :  { %v38_v5 = vunpack.c.0.s8 %v37_v2  ;;  %v14_v16 = vld [vmem:[%s132_s0] sm:$0xf] }
   0x4   :  { %v20_v6 = vsub.s32 0, %v19_v3  ;;  %v24_v7 = vsub.s32 1, %v19_v3  ;;  %v28_v8 = vsub.s32 2, %v19_v3  ;;  %v32_v9 = vsub.s32 3, %v19_v3 }
   0x5   :  { %v41_v11 = vsub.s32 %v38_v5, %v19_v3  ;;  %v15_v25 = vunpack.c.l.bf16 %v14_v16 }
   0x6   :  { %v21_v12 = vrot.slane %v16_v4, %v20_v6  ;;  %v25_v13 = vrot.slane %v16_v4, %v24_v7  ;;  %v29_v14 = vrot.slane %v16_v4, %v28_v8  ;;  %v33_v15 = vrot.slane %v16_v4, %v32_v9 }
   0x7   :  { %v58_v17 = vrot.slane %v53_v10, %v20_v6  ;;  %v62_v18 = vrot.slane %v53_v10, %v24_v7  ;;  %v66_v19 = vrot.slane %v53_v10, %v28_v8  ;;  %v70_v20 = vrot.slane %v53_v10, %v32_v9 }
   0x8   :  { %v34_v21 = vcombine.low %v21_v12, %v25_v13  ;;  %v35_v22 = vcombine.low %v29_v14, %v33_v15 }
   0x9   :  { %v71_v23 = vcombine.low %v58_v17, %v62_v18  ;;  %v72_v24 = vcombine.low %v66_v19, %v70_v20 }
   0xa   :  { %v42_v26 = vrot.slane %v34_v21, %v41_v11  ;;  %v49_v27 = vrot.slane %v35_v22, %v41_v11 }
   0xb   :  { %v79_v28 = vrot.slane %v71_v23, %v41_v11  ;;  %v86_v29 = vrot.slane %v72_v24, %v41_v11 }
   0xc   :  { %v50_v30 = vcombine.low %v42_v26, %v49_v27 }
   0xd   :  { %v87_v31 = vcombine.low %v79_v28, %v86_v29 }
   0xe   :  { %v52_v32 = vmul.f32 %v50_v30, %v15_v25 }
  0x10   :  { %v89_v33 = vadd.f32 %v87_v31, %v52_v32 }
  0x12   :  { %v90_v34 = vmax.f32 %v89_v33, 0.0 }
  0x14   :  { %91 = vst [vmem:[%s133_s3] sm:$0xff] %v90_v34 }

// kernel: downsample_forward.3
= control target key start
LH: loop header
LB: loop body
LE: loop exit
PB: predicated region body
PF: predicated region fallthrough
CT: control target
= control target key end

     0   :  { %s1295_s12 = smov 0   ;;  %s1645_s0 = inlined_call_operand.vmem [shape: f32[2,8,2,8,8], index: 0, kind: input, shape index: {}]   ;;  %s1646_s1 = inlined_call_operand.vmem [shape: bf16[36,8], index: 1, kind: input, shape index: {}]   ;;  %s1647_s2 = inlined_call_operand.vmem [shape: bf16[2,8,8,8], index: 2, kind: output, shape index: {0}]   ;;  %s1648_s3 = inlined_call_operand.vmem [shape: f32[2,2,8], index: 3, kind: output, shape index: {1}]  }
   0x1 LB: > { %s1119_s13 = sadd.s32 4294967295, %s1267_s12   ;;  %p1123_p0 = scmp.ge.s32.totalorder %s1267_s12, 1  ;;  %s1267_s12 = sphi %s1295_s12, %s14_s12  }
   0x2   : > { %p140_p1 = scmp.lt.s32.totalorder %s1267_s12, 3 }
   0x4   : > { %p141_p2 = pnand %p1123_p0, %p140_p1 }
   0x5   : > { %p168_p3 = scmp.lt.s32.totalorder (!%p141_p2), %s1119_s13, 1  ;;  %vm247_vm0 = vcmask (!%p141_p2), 27648   ;;  %vm249_vm1 = vcmask (!%p141_p2), 24576   ;;  %v1269_v0 = vmov (!%p141_p2), 0   ;;  %vm255_vm2 = vsmask.f32 (!%p141_p2), 256 }
   0x6   : > { %144 = sbr.rel (%p141_p2) target bundleno = 681 (0x2a9), region = 28  ;;  %248 = vst.msk [vmem:[#allocation2] sm:$0xf] (!%p141_p2), %vm247_vm0, %v1269_v0  ;;  %252 = vst.msk [vmem:[#allocation2 + $0x48] sm:$0xf] (!%p141_p2), %vm247_vm0, %v1269_v0  ;;  %s1270_s18 = smov (!%p141_p2), 124  }
   0x7   : > { %250 = vst.msk [vmem:[#allocation2 + $0x4] sm:$0x1] (!%p141_p2), %vm249_vm1, %v1269_v0  ;;  %253 = vst.msk [vmem:[#allocation2 + $0x4c] sm:$0x1] (!%p141_p2), %vm249_vm1, %v1269_v0  ;;  %v260_v1 = vld [vmem:[#allocation2 + $0x8] sm:$0x1] (!%p141_p2) }
   0x8   : > { %v263_v2 = vld [vmem:[#allocation2 + $0x10] sm:$0x1] (!%p141_p2)  ;;  %vm1310_vm3 = vmand (!%p141_p2), %vm249_vm1, %vm255_vm2  ;;  %vm287_vm4 = vsmask.f32 (!%p141_p2), 7938  ;;  %v292_v4 = vld [vmem:[#allocation2 + $0xc] sm:$0x1] (!%p141_p2) }
   0x9   : > { %v261_v5 = vsel (!%p141_p2), %vm1310_vm3, 0, %v260_v1  ;;  %v264_v6 = vsel (!%p141_p2), %vm1310_vm3, 0, %v263_v2  ;;  %vm1319_vm5 = vmand (!%p141_p2), %vm249_vm1, %vm287_vm4  ;;  %v295_v8 = vld [vmem:[#allocation2 + $0x14] sm:$0x1] (!%p141_p2)  ;;  %v272_v9 = vld [vmem:[#allocation2 + $0x28] sm:$0x1] (!%p141_p2) }
   0xa   : > { %262 = vst [vmem:[#allocation2 + $0x8] sm:$0x1] (!%p141_p2), %v261_v5  ;;  %265 = vst [vmem:[#allocation2 + $0x10] sm:$0x1] (!%p141_p2), %v264_v6  ;;  %v293_v10 = vsel (!%p141_p2), %vm1319_vm5, 0, %v292_v4  ;;  %v296_v11 = vsel (!%p141_p2), %vm1319_vm5, 0, %v295_v8 }
   0xb   : > { %vm1329_vm6 = vmand (!%p141_p2), %vm247_vm0, %vm287_vm4  ;;  %v273_v13 = vsel (!%p141_p2), %vm1310_vm3, 0, %v272_v9  ;;  %v304_v14 = vld [vmem:[#allocation2 + $0x2c] sm:$0x1] (!%p141_p2)  ;;  %294 = vst [vmem:[#allocation2 + $0xc] sm:$0x1] (!%p141_p2), %v293_v10  ;;  %s1271_s19 = smov (!%p141_p2), 4  }
   0xc   : > { %297 = vst [vmem:[#allocation2 + $0x14] sm:$0x1] (!%p141_p2), %v296_v11  ;;  %274 = vst [vmem:[#allocation2 + $0x28] sm:$0x1] (!%p141_p2), %v273_v13  ;;  %v305_v15 = vsel (!%p141_p2), %vm1319_vm5, 0, %v304_v14  ;;  %s1272_s20 = smov (!%p141_p2), 8  }
   0xd   : > { %s1656_s13 = smov (!%p168_p3, %s1119_s13), 1  ;;  %v266_v16 = vld [vmem:[#allocation2 + $0x18] sm:$0x1]  ;;  %v269_v17 = vld [vmem:[#allocation2 + $0x20] sm:$0x1]  ;;  %vm743_vm7 = vcmask 64512  }
   0xe   : > { %s1170_s14 = sshll.u32 %s1656_s13, 7  ;;  %306 = vst [vmem:[#allocation2 + $0x2c] sm:$0x1] %v305_v15  ;;  %v267_v21 = vsel %vm1310_vm3, 0, %v266_v16  ;;  %v270_v22 = vsel %vm1310_vm3, 0, %v269_v17  ;;  %vm712_vm8 = vcmask 31744  }
   0xf   : > { %s1338_s17 = scalar_lea.vmem %s1645_s0, %s1170_s14  ;;  %268 = vst [vmem:[#allocation2 + $0x18] sm:$0x1] %v267_v21  ;;  %271 = vst [vmem:[#allocation2 + $0x20] sm:$0x1] %v270_v22  ;;  %v257_v42 = vld [vmem:[#allocation2] sm:$0x1] }
  0x10   : > { %v183_v18 = vld [vmem:[%s1338_s17] sm:$0xff]  ;;  %v184_v19 = vld [vmem:[%s1338_s17 + $0x8] sm:$0xff]  ;;  %v185_v20 = vld [vmem:[%s1338_s17 + $0x10] sm:$0xff]  ;;  %v258_v45 = vsel %vm1310_vm3, 0, %v257_v42  ;;  %s1273_s25 = smov 12   ;;  %vm892_vm9 = vcmask 1041408  }
  0x11   : > { %v186_v23 = vld [vmem:[%s1338_s17 + $0x18] sm:$0xff]  ;;  %v1350_v24 = vmax.f32 %v183_v18, %v184_v19  ;;  %v191_v25 = vld [vmem:[%s1338_s17 + $0x40] sm:$0xff]  ;;  %v192_v26 = vld [vmem:[%s1338_s17 + $0x48] sm:$0xff]  ;;  %259 = vst [vmem:[#allocation2] sm:$0x1] %v258_v45  ;;  %s1274_s28 = smov 24  }
  0x12   : > { %v1354_v27 = vmax.f32 %v185_v20, %v186_v23  ;;  %v1356_v28 = vmax.f32 %v191_v25, %v192_v26  ;;  %v187_v29 = vld [vmem:[%s1338_s17 + $0x20] sm:$0xff]  ;;  %v188_v30 = vld [vmem:[%s1338_s17 + $0x28] sm:$0xff]  ;;  %v189_v31 = vld [vmem:[%s1338_s17 + $0x30] sm:$0xff]  ;;  %vm805_vm10 = vcmask 97280   ;;  %vm822_vm11 = vcmask 195584   ;;  %s1171_s29 = sshll.u32 %s1656_s13, 5 }
  0x13   : > { %v190_v32 = vld [vmem:[%s1338_s17 + $0x38] sm:$0xff]  ;;  %v1362_v33 = vmax.f32 %v187_v29, %v188_v30  ;;  %v193_v34 = vld [vmem:[%s1338_s17 + $0x50] sm:$0xff]  ;;  %v195_v38 = vld [vmem:[%s1338_s17 + $0x60] sm:$0xff]  ;;  %vm879_vm12 = vcmask 293888   ;;  %s1604_s5 = scalar_lea.vmem %s1647_s2, %s1171_s29  ;;  %vm1021_vm13 = vcmask 60416   ;;  %s1128_s6 = sshll.u32 %s1656_s13, 1 }
  0x14   : > { %v194_v35 = vld [vmem:[%s1338_s17 + $0x58] sm:$0xff]  ;;  %v1223_v36 = vpack.i.bf16 %v1354_v27, %v1350_v24  ;;  %223 = vrot.lane.b32.xlu1 %v1356_v28, %s1270_s18  ;;  %v1370_v37 = vmax.f32 %v189_v31, %v190_v32  ;;  %v196_v39 = vld [vmem:[%s1338_s17 + $0x68] sm:$0xff]  ;;  %v197_v48 = vld [vmem:[%s1338_s17 + $0x70] sm:$0xff]  ;;  %s181_s9 = scalar_lea.vmem %s1648_s3, %s1128_s6  ;;  %vm1030_vm14 = vcmask 57344  }
  0x15   : > { %v1374_v40 = vmax.f32 %v193_v34, %v194_v35  ;;  %v1376_v41 = vmax.f32 %v195_v38, %v196_v39  ;;  %v284_v43 = vld [vmem:[#allocation2 + $0x48] sm:$0x1]  ;;  %v198_v49 = vld [vmem:[%s1338_s17 + $0x78] sm:$0xff]  ;;  %v301_v51 = vld [vmem:[#allocation2 + $0x24] sm:$0x1] }
  0x16   : > { %1224 = vrot.lane.b32.xlu0 %v1223_v36, %s1270_s18  ;;  %v1228_v44 = vpack.i.bf16 %v1370_v37, %v1362_v33  ;;  %v285_v46 = vsel %vm1310_vm3, 0, %v284_v43  ;;  %v298_v50 = vld [vmem:[#allocation2 + $0x1c] sm:$0x1]  ;;  %v302_v53 = vsel %vm1319_vm5, 0, %v301_v51  ;;  %v1395_v54 = vmax.f32 %v197_v48, %v198_v49  ;;  %v275_v55 = vld [vmem:[#allocation2 + $0x30] sm:$0x1] }
  0x17   : > { %v1233_v47 = vpack.i.bf16 %v1376_v41, %v1374_v40  ;;  %286 = vst [vmem:[#allocation2 + $0x48] sm:$0x1] %v285_v46  ;;  %v299_v52 = vsel %vm1319_vm5, 0, %v298_v50  ;;  %303 = vst [vmem:[#allocation2 + $0x24] sm:$0x1] %v302_v53  ;;  %v276_v58 = vsel %vm1310_vm3, 0, %v275_v55 }
  0x18   : > { %300 = vst [vmem:[#allocation2 + $0x1c] sm:$0x1] %v299_v52  ;;  %v278_v56 = vld [vmem:[#allocation2 + $0x38] sm:$0x1]  ;;  %v307_v57 = vld [vmem:[#allocation2 + $0x34] sm:$0x1] }
  0x19   : > { %1234 = vrot.lane.b32.xlu1 %v1233_v47, %s1270_s18  ;;  %v279_v59 = vsel %vm1310_vm3, 0, %v278_v56  ;;  %v308_v60 = vsel %vm1319_vm5, 0, %v307_v57  ;;  %v310_v61 = vld [vmem:[#allocation2 + $0x3c] sm:$0x1]  ;;  %277 = vst [vmem:[#allocation2 + $0x30] sm:$0x1] %v276_v58 }
  0x1a   : > { %1229 = vrot.lane.b32.xlu0 %v1228_v44, %s1270_s18  ;;  %280 = vst [vmem:[#allocation2 + $0x38] sm:$0x1] %v279_v59  ;;  %309 = vst [vmem:[#allocation2 + $0x34] sm:$0x1] %v308_v60  ;;  %v311_v62 = vsel %vm1319_vm5, 0, %v310_v61 }
  0x1b   : > { %v316_v63 = vld [vmem:[#allocation2 + $0x4c] sm:$0x1]  ;;  %312 = vst [vmem:[#allocation2 + $0x3c] sm:$0x1] %v311_v62  ;;  %v281_v1 = vld [vmem:[#allocation2 + $0x40] sm:$0x1] }
  0x1c   : > { %v317_v0 = vsel %vm1319_vm5, 0, %v316_v63  ;;  %v282_v2 = vsel %vm1310_vm3, 0, %v281_v1  ;;  %v313_v4 = vld [vmem:[#allocation2 + $0x44] sm:$0x1]  ;;  %v458_v38 = vld [vmem:[#allocation2 + $0x28] sm:$0xf] }
  0x1d   : > { %318 = vst [vmem:[#allocation2 + $0x4c] sm:$0x1] %v317_v0  ;;  %283 = vst [vmem:[#allocation2 + $0x40] sm:$0x1] %v282_v2  ;;  %v314_v5 = vsel %vm1319_vm5, 0, %v313_v4 }
  0x1e   : > { %229 = vrot.lane.b32.xlu0 %v1395_v54, %s1270_s18  ;;  %315 = vst [vmem:[#allocation2 + $0x44] sm:$0x1] %v314_v5  ;;  %v1413_v6 = vld [vmem:[#allocation2 + $0x48] sm:$0xf]  ;;  %v461_v45 = vld [vmem:[#allocation2 + $0x2c] sm:$0x1] }
  0x1f   : > { %v434_v50 = vld [vmem:[#allocation2 + $0x8] sm:$0xf]  ;;  %v440_v56 = vld [vmem:[#allocation2 + $0x10] sm:$0xf]  ;;  %v289_v5 = vld [vmem:[#allocation2 + $0x4] sm:$0x1] }
  0x24   : > { %v1415_v8 = vld [vmem:[#allocation2 + $0x4c] sm:$0x1] }
  0x25   : > { %v1146_v9 = vcombine.low %v1413_v6, %v1415_v8 }
  0x27   : > { %v626_v10 = vshrl.u32 %v1146_v9, 16  ;;  %v628_v11 = vshll.u32 %v1146_v9, 16 }
  0x29   : > { %v630_v13 = vrot.slane %v628_v11, 1 }
  0x2b   : > { %v631_v14 = vor.u32 %v630_v13, %v626_v10 }
  0x2d   : > { %650 = vrot.lane.b32.xlu1 %v631_v14, %s1271_s19  ;;  %v446_v14 = vld [vmem:[#allocation2 + $0x18] sm:$0xf] }
  0x86   : > { %v224_v15 = vpop.permute.xlu1 %223 }
  0x87   : > { %v243_v16 = vmax.f32 %v1356_v28, %v224_v15  ;;  %v452_v15 = vld [vmem:[#allocation2 + $0x20] sm:$0xf] }
  0x88   : > { %v1225_v17 = vpop.permute.xlu0 %1224 }
  0x89   : > { %v1227_v18 = vunpack.i.h.bf16 %v1225_v17  ;;  %v1226_v19 = vunpack.i.l.bf16 %v1225_v17  ;;  %v1176_v20 = vpack.c.bf16 %v243_v16, %v243_v16  ;;  %v449_v16 = vld [vmem:[#allocation2 + $0x1c] sm:$0x1] }
  0x8b   : > { %v240_v21 = vmax.f32 %v1354_v27, %v1227_v18  ;;  %v239_v22 = vmax.f32 %v1350_v24, %v1226_v19  ;;  %v384_v23 = vshrl.u32 %v1176_v20, 16  ;;  %v1235_v25 = vpop.permute.xlu1 %1234  ;;  %v387_v26 = vshll.u32 %v1176_v20, 16 }
  0x8c   : > { %v1230_v29 = vpop.permute.xlu0 %1229  ;;  %v1237_v30 = vunpack.i.h.bf16 %v1235_v25  ;;  %v1236_v31 = vunpack.i.l.bf16 %v1235_v25 }
  0x8d   : > { %v1173_v32 = vpack.c.bf16 %v240_v21, %v240_v21  ;;  %v1172_v34 = vpack.c.bf16 %v239_v22, %v239_v22  ;;  %v386_v35 = vrot.slane %v384_v23, 7  ;;  %v1232_v36 = vunpack.i.h.bf16 %v1230_v29  ;;  %v455_v21 = vld [vmem:[#allocation2 + $0x24] sm:$0x1] }
  0x8e   : > { %v1231_v28 = vunpack.i.l.bf16 %v1230_v29  ;;  %v245_v39 = vmax.f32 %v1376_v41, %v1237_v30  ;;  %v244_v42 = vmax.f32 %v1374_v40, %v1236_v31  ;;  %v437_v41 = vld [vmem:[#allocation2 + $0xc] sm:$0x1]  ;;  %v443_v40 = vld [vmem:[#allocation2 + $0x14] sm:$0x1] }
  0x8f   : > { %v360_v43 = vshrl.u32 %v1173_v32, 16  ;;  %v363_v27 = vshll.u32 %v1173_v32, 16  ;;  %v352_v44 = vshrl.u32 %v1172_v34, 16  ;;  %v355_v24 = vshll.u32 %v1172_v34, 16  ;;  %v464_v34 = vld [vmem:[#allocation2 + $0x30] sm:$0xf] }
  0x90   : > { %v389_v46 = vor.u32 %v387_v26, %v386_v35  ;;  %v390_v47 = vrot.slane %v386_v35, 4  ;;  %v242_v48 = vmax.f32 %v1370_v37, %v1232_v36  ;;  %v241_v49 = vmax.f32 %v1362_v33, %v1231_v28  ;;  %v230_v4 = vpop.permute.xlu0 %229 }
  0x91   : > { %v362_v51 = vrot.slane %v360_v43, 7  ;;  %v354_v52 = vrot.slane %v352_v44, 7  ;;  %v1178_v53 = vpack.c.bf16 %v245_v39, %v245_v39  ;;  %v1427_v55 = vpack.c.bf16 %v244_v42, %v244_v42  ;;  %v467_v42 = vld [vmem:[#allocation2 + $0x34] sm:$0x1]  ;;  %v470_v43 = vld [vmem:[#allocation2 + $0x38] sm:$0xf] }
  0x92   : > { %v459_v57 = vsel %vm1329_vm6, %v389_v46, %v458_v38  ;;  %v462_v58 = vsel %vm1310_vm3, %v390_v47, %v461_v45  ;;  %v1175_v59 = vpack.c.bf16 %v242_v48, %v242_v48  ;;  %v1174_v60 = vpack.c.bf16 %v241_v49, %v241_v49 }
  0x93   : > { %v365_v37 = vor.u32 %v363_v27, %v362_v51  ;;  %v366_v61 = vrot.slane %v362_v51, 4  ;;  %v357_v33 = vor.u32 %v355_v24, %v354_v52  ;;  %v358_v62 = vrot.slane %v354_v52, 4  ;;  %460 = vst [vmem:[#allocation2 + $0x28] sm:$0xf] %v459_v57  ;;  %463 = vst [vmem:[#allocation2 + $0x2c] sm:$0x1] %v462_v58 }
  0x94   : > { %v376_v63 = vshrl.u32 %v1175_v59, 16  ;;  %v379_v0 = vshll.u32 %v1175_v59, 16  ;;  %v368_v1 = vshrl.u32 %v1174_v60, 16  ;;  %v371_v2 = vshll.u32 %v1174_v60, 16  ;;  %v473_v27 = vld [vmem:[#allocation2 + $0x3c] sm:$0x1] }
  0x95   : > { %v441_v9 = vsel %vm1329_vm6, %v365_v37, %v440_v56  ;;  %v444_v10 = vsel %vm1310_vm3, %v366_v61, %v443_v40  ;;  %v435_v11 = vsel %vm1329_vm6, %v357_v33, %v434_v50  ;;  %v438_v13 = vsel %vm1310_vm3, %v358_v62, %v437_v41  ;;  %v476_v58 = vld [vmem:[#allocation2 + $0x40] sm:$0xf]  ;;  %v479_v59 = vld [vmem:[#allocation2 + $0x44] sm:$0x1] }
  0x96   : > { %442 = vst [vmem:[#allocation2 + $0x10] sm:$0xf] %v441_v9  ;;  %445 = vst [vmem:[#allocation2 + $0x14] sm:$0x1] %v444_v10  ;;  %v378_v17 = vrot.slane %v376_v63, 7  ;;  %v370_v18 = vrot.slane %v368_v1, 7  ;;  %v246_v25 = vmax.f32 %v1395_v54, %v230_v4 }
  0x97   : > { %436 = vst [vmem:[#allocation2 + $0x8] sm:$0xf] %v435_v11  ;;  %439 = vst [vmem:[#allocation2 + $0xc] sm:$0x1] %v438_v13  ;;  %v400_v19 = vshrl.u32 %v1178_v53, 16  ;;  %v403_v20 = vshll.u32 %v1178_v53, 16 }
  0x98   : > { %v392_v22 = vshrl.u32 %v1427_v55, 16  ;;  %v395_v23 = vshll.u32 %v1427_v55, 16  ;;  %v290_v26 = vsel %vm1319_vm5, 0, %v289_v5  ;;  %v381_v29 = vor.u32 %v379_v0, %v378_v17 }
  0x99   : > { %v382_v30 = vrot.slane %v378_v17, 4  ;;  %v373_v31 = vor.u32 %v371_v2, %v370_v18  ;;  %v374_v32 = vrot.slane %v370_v18, 4  ;;  %291 = vst [vmem:[#allocation2 + $0x4] sm:$0x1] %v290_v26  ;;  %v402_v35 = vrot.slane %v400_v19, 7 }
  0x9a   : > { %v394_v36 = vrot.slane %v392_v22, 7  ;;  %v1179_v38 = vpack.c.bf16 %v246_v25, %v246_v25  ;;  %v453_v28 = vsel %vm1329_vm6, %v381_v29, %v452_v15  ;;  %v1467_v2 = vld [vmem:[#allocation2 + $0x28] sm:$0xf]  ;;  %v497_v17 = vld [vmem:[#allocation2 + $0x2c] sm:$0x1] }
  0x9b   : > { %v456_v39 = vsel %vm1310_vm3, %v382_v30, %v455_v21  ;;  %v447_v54 = vsel %vm1329_vm6, %v373_v31, %v446_v14  ;;  %v450_v7 = vsel %vm1310_vm3, %v374_v32, %v449_v16  ;;  %454 = vst [vmem:[#allocation2 + $0x20] sm:$0xf] %v453_v28  ;;  %v405_v44 = vor.u32 %v403_v20, %v402_v35  ;;  %v507_v4 = vld [vmem:[#allocation2 + $0x28] sm:$0xe] }
  0x9c   : > { %457 = vst [vmem:[#allocation2 + $0x24] sm:$0x1] %v456_v39  ;;  %448 = vst [vmem:[#allocation2 + $0x18] sm:$0xf] %v447_v54  ;;  %v406_v24 = vrot.slane %v402_v35, 4  ;;  %v397_v45 = vor.u32 %v395_v23, %v394_v36  ;;  %v398_v46 = vrot.slane %v394_v36, 4  ;;  %v1152_v22 = vcombine.low %v507_v4, %v497_v17 }
  0x9d   : > { %451 = vst [vmem:[#allocation2 + $0x1c] sm:$0x1] %v450_v7  ;;  %v408_v47 = vshrl.u32 %v1179_v38, 16  ;;  %v411_v48 = vshll.u32 %v1179_v38, 16  ;;  %v471_v49 = vsel %vm1329_vm6, %v405_v44, %v470_v43  ;;  %v494_v53 = vld [vmem:[#allocation2 + $0x14] sm:$0x1]  ;;  %v1142_v25 = vcombine.low %v1467_v2, %v497_v17 }
  0x9e   : > { %v474_v50 = vsel %vm1310_vm3, %v406_v24, %v473_v27  ;;  %v465_v51 = vsel %vm1329_vm6, %v397_v45, %v464_v34  ;;  %v468_v52 = vsel %vm1310_vm3, %v398_v46, %v467_v42  ;;  %v504_v55 = vld [vmem:[#allocation2 + $0x10] sm:$0xe]  ;;  %472 = vst [vmem:[#allocation2 + $0x38] sm:$0xf] %v471_v49  ;;  %v493_v40 = vld [vmem:[#allocation2 + $0xc] sm:$0x1] }
  0x9f   : > { %475 = vst [vmem:[#allocation2 + $0x3c] sm:$0x1] %v474_v50  ;;  %466 = vst [vmem:[#allocation2 + $0x30] sm:$0xf] %v465_v51  ;;  %v410_v41 = vrot.slane %v408_v47, 7  ;;  %v1149_v56 = vcombine.low %v504_v55, %v494_v53  ;;  %v687_v36 = vrot.slane %v1152_v22, 1 }
  0xa0   : > { %469 = vst [vmem:[#allocation2 + $0x34] sm:$0x1] %v468_v52  ;;  %v503_v57 = vld [vmem:[#allocation2 + $0x8] sm:$0xe]  ;;  %v1465_v0 = vld [vmem:[#allocation2 + $0x10] sm:$0xf] }
  0xa1   : > { %v1148_v60 = vcombine.low %v503_v57, %v493_v40  ;;  %v1462_v37 = vld [vmem:[#allocation2 + $0x8] sm:$0xf]  ;;  %v413_v61 = vor.u32 %v411_v48, %v410_v41  ;;  %v414_v33 = vrot.slane %v410_v41, 4  ;;  %v684_v62 = vrot.slane %v1149_v56, 1 }
  0xa2   : > { %v1138_v63 = vcombine.low %v1462_v37, %v493_v40  ;;  %v506_v12 = vld [vmem:[#allocation2 + $0x20] sm:$0xe]  ;;  %v1139_v19 = vcombine.low %v1465_v0, %v494_v53  ;;  %v600_v42 = vshll.u32 %v1142_v25, 16  ;;  %v598_v47 = vshrl.u32 %v1142_v25, 16  ;;  %v511_v17 = vld [vmem:[#allocation2 + $0x48] sm:$0xe] }
  0xa3   : > { %v683_v1 = vrot.slane %v1148_v60, 1  ;;  %v477_v5 = vsel %vm1329_vm6, %v413_v61, %v476_v58  ;;  %v480_v9 = vsel %vm1310_vm3, %v414_v33, %v479_v59  ;;  %696 = vrot.lane.b32.xlu0 %v684_v62, %s1272_s20  ;;  %v1474_v10 = vld [vmem:[#allocation2 + $0x18] sm:$0xf]  ;;  %v496_v16 = vld [vmem:[#allocation2 + $0x24] sm:$0x1]  ;;  %v1156_v22 = vcombine.low %v511_v17, %v1415_v8  ;;  %v1513_v8 = vpop.permute.xlu1 %650 }
  0xa4   : > { %v495_v11 = vld [vmem:[#allocation2 + $0x1c] sm:$0x1]  ;;  %v505_v13 = vld [vmem:[#allocation2 + $0x18] sm:$0xe]  ;;  %478 = vst [vmem:[#allocation2 + $0x40] sm:$0xf] %v477_v5  ;;  %v1151_v18 = vcombine.low %v506_v12, %v496_v16 }
  0xa5   : > { %481 = vst [vmem:[#allocation2 + $0x44] sm:$0x1] %v480_v9  ;;  %694 = vrot.lane.b32.xlu1 %v683_v1, %s1272_s20  ;;  %v1140_v14 = vcombine.low %v1474_v10, %v495_v11  ;;  %v1150_v15 = vcombine.low %v505_v13, %v495_v11  ;;  %v572_v3 = vshll.u32 %v1138_v63, 16  ;;  %v1479_v21 = vld [vmem:[#allocation2 + $0x20] sm:$0xf]  ;;  %v570_v34 = vshrl.u32 %v1138_v63, 16 }
  0xa6   : > { %v686_v23 = vrot.slane %v1151_v18, 1  ;;  %v508_v29 = vld [vmem:[#allocation2 + $0x30] sm:$0xe]  ;;  %v1141_v35 = vcombine.low %v1479_v21, %v496_v16  ;;  %v579_v28 = vshll.u32 %v1139_v19, 16  ;;  %v602_v50 = vrot.slane %v600_v42, 1 }
  0xa7   : > { %v685_v20 = vrot.slane %v1150_v15, 1  ;;  %v574_v26 = vrot.slane %v572_v3, 1  ;;  %v586_v30 = vshll.u32 %v1140_v14, 16  ;;  %v1483_v31 = vld [vmem:[#allocation2 + $0x30] sm:$0xf]  ;;  %v584_v44 = vshrl.u32 %v1140_v14, 16 }
  0xa8   : > { %v498_v32 = vld [vmem:[#allocation2 + $0x34] sm:$0x1]  ;;  %v581_v46 = vrot.slane %v579_v28, 1  ;;  %v593_v48 = vshll.u32 %v1141_v35, 16  ;;  %v1493_v52 = vld [vmem:[#allocation2 + $0x38] sm:$0xf]  ;;  %v603_v60 = vor.u32 %v602_v50, %v598_v47 }
  0xa9   : > { %698 = vrot.lane.b32.xlu0 %v685_v20, %s1272_s20  ;;  %700 = vrot.lane.b32.xlu1 %v686_v23, %s1272_s20  ;;  %v1153_v38 = vcombine.low %v508_v29, %v498_v32  ;;  %v575_v39 = vor.u32 %v574_v26, %v570_v34  ;;  %v1143_v54 = vcombine.low %v1483_v31, %v498_v32  ;;  %v588_v7 = vrot.slane %v586_v30, 1  ;;  %v499_v53 = vld [vmem:[#allocation2 + $0x3c] sm:$0x1]  ;;  %v1498_v58 = vld [vmem:[#allocation2] sm:$0xf] }
  0xaa   : > { %v577_v55 = vshrl.u32 %v1139_v19, 16  ;;  %v595_v40 = vrot.slane %v593_v48, 1  ;;  %v1144_v57 = vcombine.low %v1493_v52, %v499_v53  ;;  %v492_v59 = vld [vmem:[#allocation2 + $0x4] sm:$0x1]  ;;  %v509_v62 = vld [vmem:[#allocation2 + $0x38] sm:$0xe] }
  0xab   : > { %v1488_v43 = vld [vmem:[#allocation2 + $0x40] sm:$0xf]  ;;  %v688_v45 = vrot.slane %v1153_v38, 1  ;;  %v589_v49 = vor.u32 %v588_v7, %v584_v44  ;;  %v607_v51 = vshll.u32 %v1143_v54, 16  ;;  %v605_v61 = vshrl.u32 %v1143_v54, 16 }
  0xac   : > { %v500_v27 = vld [vmem:[#allocation2 + $0x44] sm:$0x1]  ;;  %v582_v56 = vor.u32 %v581_v46, %v577_v55  ;;  %v591_v63 = vshrl.u32 %v1141_v35, 16  ;;  %v1137_v5 = vcombine.low %v1498_v58, %v492_v59  ;;  %v1154_v11 = vcombine.low %v509_v62, %v499_v53  ;;  %v510_v14 = vld [vmem:[#allocation2 + $0x40] sm:$0xe] }
  0xad   : > { %702 = vrot.lane.b32.xlu0 %v687_v36, %s1272_s20  ;;  %634 = vrot.lane.b32.xlu1 %v575_v39, %s1271_s19  ;;  %v1145_v24 = vcombine.low %v1488_v43, %v500_v27  ;;  %v609_v33 = vrot.slane %v607_v51, 1  ;;  %v614_v13 = vshll.u32 %v1144_v57, 16  ;;  %v1155_v12 = vcombine.low %v510_v14, %v500_v27  ;;  %v502_v29 = vld [vmem:[#allocation2] sm:$0xe] }
  0xae   : > { %v596_v9 = vor.u32 %v595_v40, %v591_v63  ;;  %v565_v18 = vshll.u32 %v1137_v5, 16  ;;  %v689_v3 = vrot.slane %v1154_v11, 1  ;;  %v612_v19 = vshrl.u32 %v1144_v57, 16  ;;  %v1258_v7 = vld [vmem:[%s1646_s1] sm:$0xff]  }
  0xaf   : > { %v621_v41 = vshll.u32 %v1145_v24, 16  ;;  %v619_v1 = vshrl.u32 %v1145_v24, 16  ;;  %v610_v15 = vor.u32 %v609_v33, %v605_v61  ;;  %v616_v20 = vrot.slane %v614_v13, 1  ;;  %1187 = vmatprep.subr.bf16.mxu0 %v1258_v7  ;;  %1201 = vmatprep.subr.bf16.mxu1 %v1258_v7 }
  0xb0   : > { %v690_v23 = vrot.slane %v1155_v12, 1  ;;  %v563_v25 = vshrl.u32 %v1137_v5, 16  ;;  %v567_v26 = vrot.slane %v565_v18, 1  ;;  %v691_v32 = vrot.slane %v1156_v22, 1  ;;  %1188 = vmatpush3.bf16.msra.mxu0 %v1258_v7  ;;  %1204 = vmatpush3.bf16.msra.mxu1 %v1258_v7 }
  0xb1   : > { %704 = vrot.lane.b32.xlu0 %v688_v45, %s1272_s20  ;;  %638 = vrot.lane.b32.xlu1 %v589_v49, %s1271_s19  ;;  %v623_v4 = vrot.slane %v621_v41, 1  ;;  %v617_v30 = vor.u32 %v616_v20, %v612_v19  ;;  %v1147_v34 = vcombine.low %v502_v29, %v492_v59  ;;  %v1259_v45 = vld [vmem:[%s1646_s1 + $0x8] sm:$0xff]   ;;  %v1260_v49 = vld [vmem:[%s1646_s1 + $0x10] ss:$0 sps:$4 sm:$0x33]   ;;  %v742_v5 = vsel %vm712_vm8, %v1413_v6, %v1513_v8 }
  0xb2   : > { %v568_v35 = vor.u32 %v567_v26, %v563_v25  ;;  %1189 = vmatprep.subr.bf16.mxu0 %v1259_v45  ;;  %1202 = vmatprep.subr.bf16.mxu1 %v1259_v45  ;;  %v894_v55 = vsel %vm892_vm9, %v1260_v49, 0 }
  0xb3   : > { %v624_v16 = vor.u32 %v623_v4, %v619_v1  ;;  %v682_v36 = vrot.slane %v1147_v34, 1 }
  0xb4   : > { %1190 = vmatpush3.bf16.msra.mxu0 %v1259_v45  ;;  %1205 = vmatpush3.bf16.msra.mxu1 %v1259_v45 }
  0xb5   : > { %636 = vrot.lane.b32.xlu0 %v582_v56, %s1271_s19  ;;  %642 = vrot.lane.b32.xlu1 %v603_v60, %s1271_s19 }
  0xb6   : > { %1207 = vmatprep.subr.msk.bf16.mxu0 %vm892_vm9, %v1260_v49  ;;  %1208 = vmatprep.subr.msk.bf16.mxu1 %vm892_vm9, %v1260_v49 }
  0xb8   : > { %1192 = vmatpush3.bf16.msra.mxu0 %v894_v55  ;;  %1206 = vmatpush3.bf16.msra.mxu1 %v894_v55 }
  0xb9   : > { %640 = vrot.lane.b32.xlu0 %v596_v9, %s1271_s19  ;;  %644 = vrot.lane.b32.xlu1 %v610_v15, %s1271_s19 }
  0xbd   : > { %706 = vrot.lane.b32.xlu0 %v689_v3, %s1272_s20  ;;  %648 = vrot.lane.b32.xlu1 %v624_v16, %s1271_s19 }
  0xc1   : > { %646 = vrot.lane.b32.xlu0 %v617_v30, %s1271_s19  ;;  %708 = vrot.lane.b32.xlu1 %v690_v23, %s1272_s20 }
  0xc5   : > { %710 = vrot.lane.b32.xlu0 %v691_v32, %s1272_s20  ;;  %632 = vrot.lane.b32.xlu1 %v568_v35, %s1271_s19 }
  0xc9   : > { %692 = vrot.lane.b32.xlu0 %v682_v36, %s1272_s20 }
 0x115   : > { %v697_v38 = vpop.permute.xlu0 %696 }
 0x117   : > { %v695_v28 = vpop.permute.xlu1 %694 }
 0x11b   : > { %v699_v39 = vpop.permute.xlu0 %698  ;;  %v701_v54 = vpop.permute.xlu1 %700 }
 0x11f   : > { %v703_v42 = vpop.permute.xlu0 %702  ;;  %v635_v27 = vpop.permute.xlu1 %634 }
 0x120   : > { %v718_v44 = vsel %vm712_vm8, %v1462_v37, %v635_v27 }
 0x121   : > { %v1521_v24 = vsel %vm743_vm7, %v718_v44, %v695_v28 }
 0x122   : > { %772 = vrot.lane.b32.xlu1 %v1521_v24, %s1273_s25 }
 0x123   : > { %v705_v46 = vpop.permute.xlu0 %704  ;;  %v639_v47 = vpop.permute.xlu1 %638 }
 0x124   : > { %v724_v37 = vsel %vm712_vm8, %v1474_v10, %v639_v47 }
 0x125   : > { %v1531_v48 = vsel %vm743_vm7, %v724_v37, %v699_v39 }
 0x126   : > { %776 = vrot.lane.b32.xlu1 %v1531_v48, %s1273_s25 }
 0x127   : > { %v637_v50 = vpop.permute.xlu0 %636  ;;  %v643_v53 = vpop.permute.xlu1 %642 }
 0x128   : > { %v721_v51 = vsel %vm712_vm8, %v1465_v0, %v637_v50  ;;  %v730_v57 = vsel %vm712_vm8, %v1467_v2, %v643_v53 }
 0x129   : > { %v749_v10 = vsel %vm743_vm7, %v721_v51, %v697_v38  ;;  %v755_v60 = vsel %vm743_vm7, %v730_v57, %v703_v42 }
 0x12a   : > { %774 = vrot.lane.b32.xlu0 %v749_v10, %s1273_s25  ;;  %789 = vrot.lane.b32.xlu1 %v749_v10, %s1274_s28 }
 0x12b   : > { %v641_v41 = vpop.permute.xlu0 %640  ;;  %v645_v0 = vpop.permute.xlu1 %644 }
 0x12c   : > { %v727_v56 = vsel %vm712_vm8, %v1479_v21, %v641_v41  ;;  %v733_v2 = vsel %vm712_vm8, %v1483_v31, %v645_v0 }
 0x12d   : > { %v753_v40 = vsel %vm743_vm7, %v727_v56, %v701_v54  ;;  %v757_v63 = vsel %vm743_vm7, %v733_v2, %v705_v46 }
 0x12e   : > { %778 = vrot.lane.b32.xlu0 %v753_v40, %s1273_s25  ;;  %793 = vrot.lane.b32.xlu1 %v753_v40, %s1274_s28 }
 0x12f   : > { %v707_v59 = vpop.permute.xlu0 %706  ;;  %v649_v61 = vpop.permute.xlu1 %648 }
 0x130   : > { %v739_v4 = vsel %vm712_vm8, %v1488_v43, %v649_v61 }
 0x132   : > { %791 = vrot.lane.b32.xlu0 %v1531_v48, %s1274_s28  ;;  %780 = vrot.lane.b32.xlu1 %v755_v60, %s1273_s25 }
 0x133   : > { %v647_v21 = vpop.permute.xlu0 %646  ;;  %v709_v1 = vpop.permute.xlu1 %708 }
 0x134   : > { %v736_v33 = vsel %vm712_vm8, %v1493_v52, %v647_v21  ;;  %v761_v52 = vsel %vm743_vm7, %v739_v4, %v709_v1 }
 0x135   : > { %v759_v62 = vsel %vm743_vm7, %v736_v33, %v707_v59 }
 0x136   : > { %795 = vrot.lane.b32.xlu0 %v755_v60, %s1274_s28  ;;  %784 = vrot.lane.b32.xlu1 %v759_v62, %s1273_s25 }
 0x137   : > { %v711_v31 = vpop.permute.xlu0 %710  ;;  %v633_v11 = vpop.permute.xlu1 %632 }
 0x138   : > { %v763_v9 = vsel %vm743_vm7, %v742_v5, %v711_v31  ;;  %v715_v12 = vsel %vm712_vm8, %v1498_v58, %v633_v11 }
 0x13a   : > { %782 = vrot.lane.b32.xlu0 %v757_v63, %s1273_s25  ;;  %797 = vrot.lane.b32.xlu1 %v757_v63, %s1274_s28 }
 0x13b   : > { %v693_v43 = vpop.permute.xlu0 %692 }
 0x13c   : > { %v745_v18 = vsel %vm743_vm7, %v715_v12, %v693_v43 }
 0x13e   : > { %786 = vrot.lane.b32.xlu0 %v761_v52, %s1273_s25  ;;  %801 = vrot.lane.b32.xlu1 %v761_v52, %s1274_s28 }
 0x142   : > { %799 = vrot.lane.b32.xlu0 %v759_v62, %s1274_s28 }
 0x146   : > { %803 = vrot.lane.b32.xlu0 %v763_v9, %s1274_s28 }
 0x194   : > { %v773_v13 = vpop.permute.xlu1 %772 }
 0x195   : > { %v807_v6 = vsel %vm805_vm10, %v745_v18, %v773_v13 }
 0x198   : > { %v777_v14 = vpop.permute.xlu1 %776 }
 0x199   : > { %v811_v58 = vsel %vm805_vm10, %v749_v10, %v777_v14 }
 0x19c   : > { %v775_v15 = vpop.permute.xlu0 %774  ;;  %v790_v16 = vpop.permute.xlu1 %789 }
 0x19d   : > { %v809_v19 = vsel %vm805_vm10, %v1521_v24, %v775_v15  ;;  %v824_v22 = vsel %vm822_vm11, %v807_v6, %v790_v16 }
 0x1a0   : > { %v779_v17 = vpop.permute.xlu0 %778  ;;  %v794_v3 = vpop.permute.xlu1 %793 }
 0x1a1   : > { %v813_v29 = vsel %vm805_vm10, %v1531_v48, %v779_v17  ;;  %v828_v32 = vsel %vm822_vm11, %v811_v58, %v794_v3 }
 0x1a4   : > { %v792_v20 = vpop.permute.xlu0 %791  ;;  %v781_v25 = vpop.permute.xlu1 %780 }
 0x1a5   : > { %v826_v23 = vsel %vm822_vm11, %v809_v19, %v792_v20  ;;  %v815_v39 = vsel %vm805_vm10, %v753_v40, %v781_v25 }
 0x1a6   : > { %v1157_v26 = vcombine.low %v824_v22, %v826_v23 }
 0x1a8   : > { %v796_v30 = vpop.permute.xlu0 %795  ;;  %1193 = vmatprep.mubr.msk.bf16.mxu0 %vm879_vm12, %v1157_v26  ;;  %v785_v36 = vpop.permute.xlu1 %784 }
 0x1a9   : > { %v830_v34 = vsel %vm822_vm11, %v813_v29, %v796_v30  ;;  %v819_v45 = vsel %vm805_vm10, %v757_v63, %v785_v36 }
 0x1aa   : > { %v1158_v35 = vcombine.low %v828_v32, %v830_v34 }
 0x1ac   : > { %v783_v8 = vpop.permute.xlu0 %782  ;;  %1194 = vmatmul.mubr.msk.bf16.vlgmr.msra.gmra.mrb[0].mxu0 %vm879_vm12, %v1158_v35  ;;  %v798_v38 = vpop.permute.xlu1 %797 }
 0x1ad   : > { %v817_v54 = vsel %vm805_vm10, %v755_v60, %v783_v8  ;;  %v832_v42 = vsel %vm822_vm11, %v815_v39, %v798_v38 }
 0x1b0   : > { %v787_v28 = vpop.permute.xlu0 %786  ;;  %v802_v44 = vpop.permute.xlu1 %801 }
 0x1b1   : > { %v821_v46 = vsel %vm805_vm10, %v759_v62, %v787_v28  ;;  %v836_v37 = vsel %vm822_vm11, %v819_v45, %v802_v44 }
 0x1b4   : > { %v800_v7 = vpop.permute.xlu0 %799 }
 0x1b5   : > { %v834_v27 = vsel %vm822_vm11, %v817_v54, %v800_v7 }
 0x1b6   : > { %v1159_v24 = vcombine.low %v832_v42, %v834_v27 }
 0x1b8   : > { %v804_v47 = vpop.permute.xlu0 %803  ;;  %1197 = vmatprep.mubr.msk.bf16.mxu1 %vm879_vm12, %v1159_v24 }
 0x1b9   : > { %v838_v48 = vsel %vm822_vm11, %v821_v46, %v804_v47 }
 0x1ba   : > { %v1160_v49 = vcombine.low %v836_v37, %v838_v48 }
 0x1bc   : > { %1198 = vmatmul.mubr.msk.bf16.vlgmr.msra.gmra.mrb[0].mxu1 %vm879_vm12, %v1160_v49 }
 0x27f   : > { %v1195_v50 = vpop.f32.mrb[0].mxu0 }
 0x280   : > { %v1015_v51 = vpack.c.bf16 %v1195_v50, %v1195_v50  ;;  %v930_v53 = vpop.f32.mrb[1].mxu0  ;;  %v985_v56 = vmul.f32 %v1195_v50, %v1195_v50  ;;  %v964_v33 = vsel %vm743_vm7, %v1195_v50, 0.0 }
 0x281   : > { %v983_v10 = vmul.f32 %v930_v53, %v930_v53  ;;  %v1013_v55 = vpack.c.bf16 %v930_v53, %v930_v53  ;;  %v1196_v41 = vpop.f32.mrb[2].mxu0  ;;  %v961_v57 = vsel %vm743_vm7, %v930_v53, 0.0 }
 0x282   : > { %1024 = vst.msk [vmem:[%s1604_s5 + $0x8] sm:$0xf] %vm1021_vm13, %v1015_v51  ;;  %v1016_v40 = vpack.c.bf16 %v1196_v41, %v1196_v41  ;;  %v933_v0 = vpop.f32.mrb[3].mxu0  ;;  %v986_v2 = vmul.f32 %v1196_v41, %v1196_v41  ;;  %v994_v52 = vsel %vm743_vm7, %v985_v56, 0.0  ;;  %v966_v31 = vsel %vm743_vm7, %v1196_v41, 0.0 }
 0x283   : > { %1022 = vst.msk [vmem:[%s1604_s5] sm:$0xf] %vm1021_vm13, %v1013_v55  ;;  %v962_v59 = vsel %vm743_vm7, %v933_v0, 0.0  ;;  %v984_v60 = vmul.f32 %v933_v0, %v933_v0  ;;  %v1014_v21 = vpack.c.bf16 %v933_v0, %v933_v0  ;;  %v991_v62 = vsel %vm743_vm7, %v983_v10, 0.0 }
 0x284   : > { %1025 = vst.msk [vmem:[%s1604_s5 + $0xc] sm:$0xf] %vm1021_vm13, %v1016_v40  ;;  %v963_v61 = vadd.f32 %v962_v59, %v961_v57  ;;  %v996_v11 = vsel %vm743_vm7, %v986_v2, 0.0 }
 0x285   : > { %v992_v63 = vsel %vm743_vm7, %v984_v60, 0.0  ;;  %1023 = vst.msk [vmem:[%s1604_s5 + $0x4] sm:$0xf] %vm1021_vm13, %v1014_v21 }
 0x286   : > { %v965_v1 = vadd.f32 %v964_v33, %v963_v61  ;;  %v993_v4 = vadd.f32 %v992_v63, %v991_v62 }
 0x288   : > { %v995_v5 = vadd.f32 %v994_v52, %v993_v4  ;;  %v967_v9 = vadd.f32 %v966_v31, %v965_v1 }
 0x28a   : > { %v997_v13 = vadd.f32 %v996_v11, %v995_v5 }
 0x28f   : > { %v1199_v43 = vpop.f32.mrb[0].mxu1 }
 0x290   : > { %v1019_v14 = vpack.c.bf16 %v1199_v43, %v1199_v43  ;;  %v946_v15 = vpop.f32.mrb[1].mxu1  ;;  %v989_v3 = vmul.f32 %v1199_v43, %v1199_v43  ;;  %v972_v30 = vsel %vm743_vm7, %v1199_v43, 0.0 }
 0x291   : > { %v968_v16 = vsel %vm743_vm7, %v946_v15, 0.0  ;;  %v987_v12 = vmul.f32 %v946_v15, %v946_v15  ;;  %v1017_v17 = vpack.c.bf16 %v946_v15, %v946_v15  ;;  %v1200_v18 = vpop.f32.mrb[2].mxu1 }
 0x292   : > { %1028 = vst.msk [vmem:[%s1604_s5 + $0x18] sm:$0xf] %vm1021_vm13, %v1019_v14  ;;  %v969_v6 = vadd.f32 %v968_v16, %v967_v9  ;;  %v949_v19 = vpop.f32.mrb[3].mxu1  ;;  %v1020_v22 = vpack.c.bf16 %v1200_v18, %v1200_v18  ;;  %v990_v32 = vmul.f32 %v1200_v18, %v1200_v18  ;;  %v1002_v8 = vsel %vm743_vm7, %v989_v3, 0.0 }
 0x293   : > { %v998_v20 = vsel %vm743_vm7, %v987_v12, 0.0  ;;  %1026 = vst.msk [vmem:[%s1604_s5 + $0x10] sm:$0xf] %vm1021_vm13, %v1017_v17  ;;  %v970_v23 = vsel %vm743_vm7, %v949_v19, 0.0  ;;  %v988_v25 = vmul.f32 %v949_v19, %v949_v19  ;;  %v1018_v29 = vpack.c.bf16 %v949_v19, %v949_v19 }
 0x294   : > { %v999_v26 = vadd.f32 %v998_v20, %v997_v13  ;;  %v971_v58 = vadd.f32 %v970_v23, %v969_v6  ;;  %1029 = vst.msk [vmem:[%s1604_s5 + $0x1c] sm:$0xf] %vm1021_vm13, %v1020_v22  ;;  %v974_v38 = vsel %vm743_vm7, %v1200_v18, 0.0  ;;  %v1004_v54 = vsel %vm743_vm7, %v990_v32, 0.0 }
 0x295   : > { %v1000_v34 = vsel %vm743_vm7, %v988_v25, 0.0  ;;  %1027 = vst.msk [vmem:[%s1604_s5 + $0x14] sm:$0xf] %vm1021_vm13, %v1018_v29 }
 0x296   : > { %v973_v35 = vadd.f32 %v972_v30, %v971_v58  ;;  %v1001_v36 = vadd.f32 %v1000_v34, %v999_v26 }
 0x298   : > { %v975_v28 = vadd.f32 %v974_v38, %v973_v35  ;;  %v1003_v39 = vadd.f32 %v1002_v8, %v1001_v36 }
 0x29a   : > { %v976_v7 = vrot.slane %v975_v28, 4  ;;  %v1005_v42 = vadd.f32 %v1004_v54, %v1003_v39 }
 0x29c   : > { %v977_v27 = vadd.f32 %v976_v7, %v975_v28  ;;  %v1006_v44 = vrot.slane %v1005_v42, 4 }
 0x29e   : > { %v978_v24 = vrot.slane %v977_v27, 2  ;;  %v1007_v45 = vadd.f32 %v1006_v44, %v1005_v42 }
 0x2a0   : > { %v979_v46 = vadd.f32 %v978_v24, %v977_v27  ;;  %v1008_v47 = vrot.slane %v1007_v45, 2 }
 0x2a2   : > { %v980_v37 = vrot.slane %v979_v46, 1  ;;  %v1009_v48 = vadd.f32 %v1008_v47, %v1007_v45 }
 0x2a4   : > { %v981_v49 = vadd.f32 %v980_v37, %v979_v46  ;;  %v1010_v50 = vrot.slane %v1009_v48, 1 }
 0x2a6   : > { %v1011_v51 = vadd.f32 %v1010_v50, %v1009_v48  ;;  %1031 = vst.msk [vmem:[%s181_s9] sm:$0x1] %vm1030_vm14, %v981_v49 }
 0x2a8   : > { %1032 = vst.msk [vmem:[%s181_s9 + $0x1] sm:$0x1] %vm1030_vm14, %v1011_v51 }
 0x2a9 PF: > { %s14_s12 = sadd.s32 1, %s1267_s12  }
 0x2aa   : > { %p11_p4 = scmp.ge.s32.totalorder %s14_s12, 4  }
 0x2ac   :  { %13 = sbr.rel (!%p11_p4) target bundleno = 1 (0x1), region = 72 }

// kernel: downsample_forward.4
= control target key start
LH: loop header
LB: loop body
LE: loop exit
PB: predicated region body
PF: predicated region fallthrough
CT: control target
= control target key end

     0   :  { %s1380_s18 = smov 0   ;;  %s1737_s0 = inlined_call_operand.vmem [shape: bf16[2,8,8,8], index: 0, kind: input, shape index: {}]   ;;  %s1738_s1 = inlined_call_operand.vmem [shape: f32[1,8], index: 1, kind: input, shape index: {}]   ;;  %s1739_s2 = inlined_call_operand.vmem [shape: f32[1,8], index: 2, kind: input, shape index: {}]   ;;  %s1740_s3 = inlined_call_operand.vmem [shape: bf16[72,8], index: 3, kind: input, shape index: {}]   ;;  %s1741_s4 = inlined_call_operand.vmem [shape: bf16[2,8,8,8], index: 4, kind: output, shape index: {0}]   ;;  %s1742_s5 = inlined_call_operand.vmem [shape: f32[2,2,8], index: 5, kind: output, shape index: {1}]  }
   0x1 LB: > { %s1177_s19 = sadd.s32 4294967295, %s1343_s18   ;;  %p1181_p0 = scmp.ge.s32.totalorder %s1343_s18, 1  ;;  %s1343_s18 = sphi %s1380_s18, %s16_s18  }
   0x2   : > { %p190_p1 = scmp.lt.s32.totalorder %s1343_s18, 3 }
   0x4   : > { %p191_p2 = pnand %p1181_p0, %p190_p1 }
   0x5   : > { %vm291_vm0 = vcmask (!%p191_p2), 60416   ;;  %vm293_vm1 = vcmask (!%p191_p2), 57344   ;;  %vm299_vm2 = vsmask.f32 (!%p191_p2), 256  ;;  %v1345_v0 = vmov (!%p191_p2), 0   ;;  %p222_p3 = scmp.lt.s32.totalorder (!%p191_p2), %s1177_s19, 1 }
   0x6   : > { %194 = sbr.rel (%p191_p2) target bundleno = 568 (0x238), region = 36  ;;  %296 = vst.msk [vmem:[#allocation2 + $0x48] sm:$0xf] (!%p191_p2), %vm291_vm0, %v1345_v0  ;;  %vm1391_vm3 = vmand (!%p191_p2), %vm293_vm1, %vm299_vm2  ;;  %vm331_vm4 = vsmask.f32 (!%p191_p2), 7938  ;;  %s1346_s28 = smov (!%p191_p2), 8  }
   0x7   : > { %297 = vst.msk [vmem:[#allocation2 + $0x4c] sm:$0x1] (!%p191_p2), %vm293_vm1, %v1345_v0  ;;  %294 = vst.msk [vmem:[#allocation2 + $0x4] sm:$0x1] (!%p191_p2), %vm293_vm1, %v1345_v0  ;;  %v307_v3 = vld [vmem:[#allocation2 + $0x10] sm:$0x1] (!%p191_p2) }
   0x8   : > { %292 = vst.msk [vmem:[#allocation2] sm:$0xf] (!%p191_p2), %vm291_vm0, %v1345_v0  ;;  %vm1399_vm5 = vmand (!%p191_p2), %vm293_vm1, %vm331_vm4  ;;  %v308_v4 = vsel (!%p191_p2), %vm1391_vm3, 0, %v307_v3  ;;  %v339_v5 = vld [vmem:[#allocation2 + $0x14] sm:$0x1] (!%p191_p2)  ;;  %s1347_s29 = smov (!%p191_p2), 16  }
   0x9   : > { %v304_v6 = vld [vmem:[#allocation2 + $0x8] sm:$0x1] (!%p191_p2)  ;;  %309 = vst [vmem:[#allocation2 + $0x10] sm:$0x1] (!%p191_p2), %v308_v4  ;;  %v340_v7 = vsel (!%p191_p2), %vm1399_vm5, 0, %v339_v5  ;;  %vm1487_vm6 = vmand (!%p191_p2), %vm291_vm0, %vm331_vm4  ;;  %vm787_vm7 = vcmask (!%p191_p2), 130048  }
   0xa   : > { %v305_v8 = vsel (!%p191_p2), %vm1391_vm3, 0, %v304_v6  ;;  %v336_v9 = vld [vmem:[#allocation2 + $0xc] sm:$0x1] (!%p191_p2)  ;;  %v310_v10 = vld [vmem:[#allocation2 + $0x18] sm:$0x1] (!%p191_p2)  ;;  %vm756_vm8 = vcmask (!%p191_p2), 64512  }
   0xb   : > { %v1415_v11 = vld [vmem:[%s1738_s1] ss:$0 sm:$0xff] (!%p191_p2)  ;;  %341 = vst [vmem:[#allocation2 + $0x14] sm:$0x1] (!%p191_p2), %v340_v7  ;;  %306 = vst [vmem:[#allocation2 + $0x8] sm:$0x1] (!%p191_p2), %v305_v8 }
   0xc   : > { %v337_v12 = vsel (!%p191_p2), %vm1399_vm5, 0, %v336_v9  ;;  %v311_v13 = vsel (!%p191_p2), %vm1391_vm3, 0, %v310_v10  ;;  %v342_v14 = vld [vmem:[#allocation2 + $0x1c] sm:$0x1] (!%p191_p2)  ;;  %v313_v16 = vld [vmem:[#allocation2 + $0x20] sm:$0x1] (!%p191_p2) }
   0xd   : > { %s1750_s19 = smov (!%p222_p3, %s1177_s19), 1  ;;  %338 = vst [vmem:[#allocation2 + $0xc] sm:$0x1] %v337_v12  ;;  %312 = vst [vmem:[#allocation2 + $0x18] sm:$0x1] %v311_v13  ;;  %v343_v15 = vsel %vm1399_vm5, 0, %v342_v14 }
   0xe   : > { %s1232_s20 = sshll.u32 %s1750_s19, 5  ;;  %v345_v17 = vld [vmem:[#allocation2 + $0x24] sm:$0x1]  ;;  %v1434_v19 = vld [vmem:[%s1739_s2] ss:$0 sm:$0xff]  ;;  %v314_v21 = vsel %vm1391_vm3, 0, %v313_v16 }
   0xf   : > { %s1426_s25 = scalar_lea.vmem %s1737_s0, %s1232_s20  ;;  %344 = vst [vmem:[#allocation2 + $0x1c] sm:$0x1] %v343_v15  ;;  %v346_v22 = vsel %vm1399_vm5, 0, %v345_v17  ;;  %v328_v24 = vld [vmem:[#allocation2 + $0x48] sm:$0x1]  ;;  %s1348_s9 = smov 24  }
  0x10   : > { %v1243_v18 = vld [vmem:[%s1426_s25] sm:$0xff]   ;;  %v1258_v20 = vld [vmem:[%s1426_s25 + $0x8] sm:$0xff]   ;;  %v1259_v23 = vld [vmem:[%s1426_s25 + $0x10] sm:$0xff]   ;;  %315 = vst [vmem:[#allocation2 + $0x20] sm:$0x1] %v314_v21  ;;  %v329_v31 = vsel %vm1391_vm3, 0, %v328_v24  ;;  %s1694_s22 = scalar_lea.vmem %s1741_s4, %s1232_s20 }
  0x11   : > { %v360_v25 = vld [vmem:[#allocation2 + $0x4c] sm:$0x1]  ;;  %v1245_v26 = vunpack.c.h.bf16 %v1243_v18  ;;  %v1244_v27 = vunpack.c.l.bf16 %v1243_v18  ;;  %v1248_v28 = vunpack.c.l.bf16 %v1258_v20  ;;  %v1249_v29 = vunpack.c.h.bf16 %v1258_v20  ;;  %347 = vst [vmem:[#allocation2 + $0x24] sm:$0x1] %v346_v22  ;;  %v316_v30 = vld [vmem:[#allocation2 + $0x28] sm:$0x1] }
  0x12   : > { %v361_v32 = vsel %vm1399_vm5, 0, %v360_v25  ;;  %v1252_v33 = vunpack.c.l.bf16 %v1259_v23  ;;  %v317_v34 = vsel %vm1391_vm3, 0, %v316_v30  ;;  %v348_v35 = vld [vmem:[#allocation2 + $0x2c] sm:$0x1]  ;;  %330 = vst [vmem:[#allocation2 + $0x48] sm:$0x1] %v329_v31  ;;  %v1253_v45 = vunpack.c.h.bf16 %v1259_v23 }
  0x13   : > { %362 = vst [vmem:[#allocation2 + $0x4c] sm:$0x1] %v361_v32  ;;  %v261_v36 = vmul.f32 %v1245_v26, %v1415_v11  ;;  %v260_v37 = vmul.f32 %v1244_v27, %v1415_v11  ;;  %v262_v38 = vmul.f32 %v1248_v28, %v1415_v11  ;;  %v263_v39 = vmul.f32 %v1249_v29, %v1415_v11  ;;  %v319_v40 = vld [vmem:[#allocation2 + $0x30] sm:$0x1]  ;;  %v351_v41 = vld [vmem:[#allocation2 + $0x34] sm:$0x1] }
  0x14   : > { %318 = vst [vmem:[#allocation2 + $0x28] sm:$0x1] %v317_v34  ;;  %v1453_v42 = vld [vmem:[%s1426_s25 + $0x18] sm:$0xff]   ;;  %v264_v43 = vmul.f32 %v1252_v33, %v1415_v11  ;;  %v349_v44 = vsel %vm1399_vm5, 0, %v348_v35  ;;  %v320_v46 = vsel %vm1391_vm3, 0, %v319_v40  ;;  %v265_v52 = vmul.f32 %v1253_v45, %v1415_v11  ;;  %s1349_s16 = smov 48  }
  0x15   : > { %v276_v47 = vadd.f32 %v1434_v19, %v261_v36  ;;  %v275_v48 = vadd.f32 %v1434_v19, %v260_v37  ;;  %v277_v49 = vadd.f32 %v1434_v19, %v262_v38  ;;  %v278_v50 = vadd.f32 %v1434_v19, %v263_v39  ;;  %350 = vst [vmem:[#allocation2 + $0x2c] sm:$0x1] %v349_v44  ;;  %v484_v14 = vld [vmem:[#allocation2 + $0x10] sm:$0xf]  ;;  %v487_v15 = vld [vmem:[#allocation2 + $0x14] sm:$0x1] }
  0x16   : > { %321 = vst [vmem:[#allocation2 + $0x30] sm:$0x1] %v320_v46  ;;  %v279_v51 = vadd.f32 %v1434_v19, %v264_v43  ;;  %v352_v53 = vsel %vm1399_vm5, 0, %v351_v41  ;;  %v1256_v54 = vunpack.c.l.bf16 %v1453_v42  ;;  %v1477_v6 = vadd.f32 %v1434_v19, %v265_v52  ;;  %v478_v17 = vld [vmem:[#allocation2 + $0x8] sm:$0xf]  ;;  %s1186_s20 = sshll.u32 %s1750_s19, 1 }
  0x17   : > { %v284_v55 = vmax.f32 %v276_v47, 0.0  ;;  %v283_v56 = vmax.f32 %v275_v48, 0.0  ;;  %v285_v57 = vmax.f32 %v277_v49, 0.0  ;;  %v286_v58 = vmax.f32 %v278_v50, 0.0  ;;  %353 = vst [vmem:[#allocation2 + $0x34] sm:$0x1] %v352_v53  ;;  %s235_s25 = scalar_lea.vmem %s1742_s5, %s1186_s20 }
  0x18   : > { %v287_v59 = vmax.f32 %v279_v51, 0.0  ;;  %v266_v60 = vmul.f32 %v1256_v54, %v1415_v11  ;;  %v1257_v7 = vunpack.c.h.bf16 %v1453_v42  ;;  %v481_v26 = vld [vmem:[#allocation2 + $0xc] sm:$0x1]  ;;  %v490_v27 = vld [vmem:[#allocation2 + $0x18] sm:$0xf]  ;;  %vm952_vm9 = vcmask 1043456  }
  0x19   : > { %v1235_v61 = vpack.c.bf16 %v284_v55, %v284_v55  ;;  %v1234_v62 = vpack.c.bf16 %v283_v56, %v283_v56  ;;  %v1236_v63 = vpack.c.bf16 %v285_v57, %v285_v57  ;;  %v1237_v0 = vpack.c.bf16 %v286_v58, %v286_v58  ;;  %v1470_v3 = vld [vmem:[#allocation2 + $0x48] sm:$0xf]  ;;  %v493_v28 = vld [vmem:[#allocation2 + $0x1c] sm:$0x1]  ;;  %v496_v33 = vld [vmem:[#allocation2 + $0x20] sm:$0xf] }
  0x1a   : > { %v1472_v4 = vld [vmem:[#allocation2 + $0x4c] sm:$0x1]  ;;  %v1474_v5 = vpack.c.bf16 %v287_v59, %v287_v59  ;;  %v1481_v8 = vadd.f32 %v1434_v19, %v266_v60  ;;  %v499_v39 = vld [vmem:[#allocation2 + $0x24] sm:$0x1]  ;;  %v322_v40 = vld [vmem:[#allocation2 + $0x38] sm:$0x1] }
  0x1b   : > { %v1206_v9 = vcombine.low %v1470_v3, %v1472_v4  ;;  %v404_v10 = vshrl.u32 %v1235_v61, 16  ;;  %v407_v12 = vshll.u32 %v1235_v61, 16  ;;  %v396_v13 = vshrl.u32 %v1234_v62, 16  ;;  %v354_v41 = vld [vmem:[#allocation2 + $0x3c] sm:$0x1] }
  0x1c   : > { %v399_v16 = vshll.u32 %v1234_v62, 16  ;;  %v412_v18 = vshrl.u32 %v1236_v63, 16  ;;  %v415_v20 = vshll.u32 %v1236_v63, 16  ;;  %v420_v21 = vshrl.u32 %v1237_v0, 16  ;;  %v325_v51 = vld [vmem:[#allocation2 + $0x40] sm:$0x1] }
  0x1d   : > { %v670_v22 = vshrl.u32 %v1206_v9, 16  ;;  %v672_v23 = vshll.u32 %v1206_v9, 16  ;;  %v406_v24 = vrot.slane %v404_v10, 7  ;;  %v398_v25 = vrot.slane %v396_v13, 7  ;;  %v357_v52 = vld [vmem:[#allocation2 + $0x44] sm:$0x1] }
  0x1e   : > { %v414_v30 = vrot.slane %v412_v18, 7  ;;  %v422_v31 = vrot.slane %v420_v21, 7  ;;  %v423_v32 = vshll.u32 %v1237_v0, 16  ;;  %v428_v34 = vshrl.u32 %v1474_v5, 16  ;;  %v502_v60 = vld [vmem:[#allocation2 + $0x28] sm:$0xf] }
  0x1f   : > { %v674_v35 = vrot.slane %v672_v23, 1  ;;  %v409_v36 = vor.u32 %v407_v12, %v406_v24  ;;  %v410_v37 = vrot.slane %v406_v24, 4  ;;  %v401_v38 = vor.u32 %v399_v16, %v398_v25  ;;  %v505_v63 = vld [vmem:[#allocation2 + $0x2c] sm:$0x1] }
  0x20   : > { %v402_v43 = vrot.slane %v398_v25, 4  ;;  %v417_v44 = vor.u32 %v415_v20, %v414_v30  ;;  %v418_v45 = vrot.slane %v414_v30, 4  ;;  %v425_v46 = vor.u32 %v423_v32, %v422_v31 }
  0x21   : > { %v675_v47 = vor.u32 %v674_v35, %v670_v22  ;;  %v485_v48 = vsel %vm1487_vm6, %v409_v36, %v484_v14  ;;  %v488_v49 = vsel %vm1391_vm3, %v410_v37, %v487_v15  ;;  %v479_v50 = vsel %vm1487_vm6, %v401_v38, %v478_v17 }
  0x22   : > { %486 = vst [vmem:[#allocation2 + $0x10] sm:$0xf] %v485_v48  ;;  %489 = vst [vmem:[#allocation2 + $0x14] sm:$0x1] %v488_v49  ;;  %v482_v53 = vsel %vm1391_vm3, %v402_v43, %v481_v26  ;;  %v491_v54 = vsel %vm1487_vm6, %v417_v44, %v490_v27  ;;  %v494_v55 = vsel %vm1391_vm3, %v418_v45, %v493_v28  ;;  %v426_v56 = vrot.slane %v422_v31, 4 }
  0x23   : > { %480 = vst [vmem:[#allocation2 + $0x8] sm:$0xf] %v479_v50  ;;  %694 = vrot.lane.b32.xlu0 %v675_v47, %s1346_s28  ;;  %483 = vst [vmem:[#allocation2 + $0xc] sm:$0x1] %v482_v53  ;;  %v497_v57 = vsel %vm1487_vm6, %v425_v46, %v496_v33  ;;  %v430_v58 = vrot.slane %v428_v34, 7  ;;  %v431_v59 = vshll.u32 %v1474_v5, 16 }
  0x24   : > { %492 = vst [vmem:[#allocation2 + $0x18] sm:$0xf] %v491_v54  ;;  %495 = vst [vmem:[#allocation2 + $0x1c] sm:$0x1] %v494_v55  ;;  %v288_v61 = vmax.f32 %v1477_v6, 0.0  ;;  %v500_v62 = vsel %vm1391_vm3, %v426_v56, %v499_v39  ;;  %v289_v0 = vmax.f32 %v1481_v8, 0.0  ;;  %v267_v6 = vmul.f32 %v1257_v7, %v1415_v11 }
  0x25   : > { %498 = vst [vmem:[#allocation2 + $0x20] sm:$0xf] %v497_v57  ;;  %v323_v9 = vsel %vm1391_vm3, 0, %v322_v40  ;;  %v355_v10 = vsel %vm1399_vm5, 0, %v354_v41  ;;  %501 = vst [vmem:[#allocation2 + $0x24] sm:$0x1] %v500_v62  ;;  %v433_v12 = vor.u32 %v431_v59, %v430_v58 }
  0x26   : > { %v434_v13 = vrot.slane %v430_v58, 4  ;;  %v1239_v5 = vpack.c.bf16 %v288_v61, %v288_v61  ;;  %324 = vst [vmem:[#allocation2 + $0x38] sm:$0x1] %v323_v9  ;;  %356 = vst [vmem:[#allocation2 + $0x3c] sm:$0x1] %v355_v10  ;;  %v326_v14 = vsel %vm1391_vm3, 0, %v325_v51  ;;  %v1527_v18 = vpack.c.bf16 %v289_v0, %v289_v0 }
  0x27   : > { %v358_v8 = vsel %vm1399_vm5, 0, %v357_v52  ;;  %v503_v15 = vsel %vm1487_vm6, %v433_v12, %v502_v60  ;;  %327 = vst [vmem:[#allocation2 + $0x40] sm:$0x1] %v326_v14  ;;  %v282_v20 = vadd.f32 %v1434_v19, %v267_v6  ;;  %v508_v52 = vld [vmem:[#allocation2 + $0x30] sm:$0xf]  ;;  %vm849_vm10 = vcmask 195584  }
  0x28   : > { %v506_v16 = vsel %vm1391_vm3, %v434_v13, %v505_v63  ;;  %359 = vst [vmem:[#allocation2 + $0x44] sm:$0x1] %v358_v8  ;;  %504 = vst [vmem:[#allocation2 + $0x28] sm:$0xf] %v503_v15  ;;  %v436_v17 = vshrl.u32 %v1239_v5, 16  ;;  %v439_v34 = vshll.u32 %v1239_v5, 16 }
  0x29   : > { %507 = vst [vmem:[#allocation2 + $0x2c] sm:$0x1] %v506_v16  ;;  %v538_v11 = vld [vmem:[#allocation2 + $0x14] sm:$0x1]  ;;  %v548_v42 = vld [vmem:[#allocation2 + $0x10] sm:$0xe] }
  0x2a   : > { %v1529_v7 = vld [vmem:[#allocation2 + $0x10] sm:$0xf]  ;;  %v1209_v21 = vcombine.low %v548_v42, %v538_v11  ;;  %v537_v23 = vld [vmem:[#allocation2 + $0xc] sm:$0x1]  ;;  %v547_v24 = vld [vmem:[#allocation2 + $0x8] sm:$0xe] }
  0x2b   : > { %v1533_v22 = vcombine.low %v1529_v7, %v538_v11  ;;  %v1535_v25 = vld [vmem:[#allocation2 + $0x8] sm:$0xf]  ;;  %v1208_v26 = vcombine.low %v547_v24, %v537_v23  ;;  %v539_v28 = vld [vmem:[#allocation2 + $0x1c] sm:$0x1]  ;;  %v549_v30 = vld [vmem:[#allocation2 + $0x18] sm:$0xe] }
  0x2c   : > { %v1198_v27 = vcombine.low %v1535_v25, %v537_v23  ;;  %v728_v31 = vrot.slane %v1209_v21, 1  ;;  %v1210_v32 = vcombine.low %v549_v30, %v539_v28  ;;  %v540_v33 = vld [vmem:[#allocation2 + $0x24] sm:$0x1]  ;;  %v444_v35 = vshrl.u32 %v1527_v18, 16  ;;  %v550_v37 = vld [vmem:[#allocation2 + $0x20] sm:$0xe] }
  0x2d   : > { %v623_v19 = vshll.u32 %v1533_v22, 16  ;;  %v727_v36 = vrot.slane %v1208_v26, 1  ;;  %v290_v39 = vmax.f32 %v282_v20, 0.0  ;;  %v1211_v41 = vcombine.low %v550_v37, %v540_v33  ;;  %v511_v53 = vld [vmem:[#allocation2 + $0x34] sm:$0x1] }
  0x2e   : > { %v616_v38 = vshll.u32 %v1198_v27, 16  ;;  %740 = vrot.lane.b32.xlu1 %v728_v31, %s1347_s29  ;;  %v729_v40 = vrot.slane %v1210_v32, 1  ;;  %v614_v43 = vshrl.u32 %v1198_v27, 16  ;;  %v438_v44 = vrot.slane %v436_v17, 7  ;;  %v1545_v54 = vld [vmem:[#allocation2 + $0x18] sm:$0xf] }
  0x2f   : > { %738 = vrot.lane.b32.xlu0 %v727_v36, %s1347_s29  ;;  %v1542_v45 = vld [vmem:[#allocation2 + $0x28] sm:$0xf]  ;;  %v730_v48 = vrot.slane %v1211_v41, 1  ;;  %v1241_v57 = vpack.c.bf16 %v290_v39, %v290_v39  ;;  %v621_v59 = vshrl.u32 %v1533_v22, 16  ;;  %v625_v60 = vrot.slane %v623_v19, 1 }
  0x30   : > { %v541_v46 = vld [vmem:[#allocation2 + $0x2c] sm:$0x1]  ;;  %v551_v47 = vld [vmem:[#allocation2 + $0x28] sm:$0xe]  ;;  %v618_v51 = vrot.slane %v616_v38, 1  ;;  %v441_v55 = vor.u32 %v439_v34, %v438_v44  ;;  %v442_v56 = vrot.slane %v438_v44, 4  ;;  %v1200_v13 = vcombine.low %v1545_v54, %v539_v28 }
  0x31   : > { %v1202_v49 = vcombine.low %v1542_v45, %v541_v46  ;;  %v1212_v50 = vcombine.low %v551_v47, %v541_v46  ;;  %v447_v61 = vshll.u32 %v1527_v18, 16  ;;  %v301_v62 = vld [vmem:[#allocation2] sm:$0x1]  ;;  %v333_v12 = vld [vmem:[#allocation2 + $0x4] sm:$0x1]  ;;  %v446_v6 = vrot.slane %v444_v35, 7 }
  0x32   : > { %742 = vrot.lane.b32.xlu1 %v729_v40, %s1347_s29  ;;  %v619_v63 = vor.u32 %v618_v51, %v614_v43  ;;  %v509_v0 = vsel %vm1487_vm6, %v441_v55, %v508_v52  ;;  %v512_v9 = vsel %vm1391_vm3, %v442_v56, %v511_v53  ;;  %v1556_v5 = vld [vmem:[#allocation2 + $0x20] sm:$0xf]  ;;  %v514_v14 = vld [vmem:[#allocation2 + $0x38] sm:$0xf]  ;;  %v517_v8 = vld [vmem:[#allocation2 + $0x3c] sm:$0x1]  ;;  %v626_v20 = vor.u32 %v625_v60, %v621_v59 }
  0x33   : > { %v731_v58 = vrot.slane %v1212_v50, 1  ;;  %744 = vrot.lane.b32.xlu0 %v730_v48, %s1347_s29  ;;  %v644_v10 = vshll.u32 %v1202_v49, 16  ;;  %510 = vst [vmem:[#allocation2 + $0x30] sm:$0xf] %v509_v0  ;;  %513 = vst [vmem:[#allocation2 + $0x34] sm:$0x1] %v512_v9  ;;  %v449_v11 = vor.u32 %v447_v61, %v446_v6  ;;  %v1201_v24 = vcombine.low %v1556_v5, %v540_v33 }
  0x34   : > { %v452_v15 = vshrl.u32 %v1241_v57, 16  ;;  %v455_v16 = vshll.u32 %v1241_v57, 16  ;;  %v302_v17 = vsel %vm1391_vm3, 0, %v301_v62  ;;  %v642_v18 = vshrl.u32 %v1202_v49, 16  ;;  %v520_v30 = vld [vmem:[#allocation2 + $0x40] sm:$0xf] }
  0x35   : > { %v450_v42 = vrot.slane %v446_v6, 4  ;;  %303 = vst [vmem:[#allocation2] sm:$0x1] %v302_v17  ;;  %v646_v21 = vrot.slane %v644_v10, 1  ;;  %v334_v23 = vsel %vm1399_vm5, 0, %v333_v12  ;;  %v630_v26 = vshll.u32 %v1200_v13, 16 }
  0x36   : > { %746 = vrot.lane.b32.xlu1 %v731_v58, %s1347_s29  ;;  %v454_v22 = vrot.slane %v452_v15, 7  ;;  %v515_v27 = vsel %vm1487_vm6, %v449_v11, %v514_v14  ;;  %v523_v31 = vld [vmem:[#allocation2 + $0x44] sm:$0x1]  ;;  %335 = vst [vmem:[#allocation2 + $0x4] sm:$0x1] %v334_v23  ;;  %v628_v35 = vshrl.u32 %v1200_v13, 16 }
  0x37   : > { %678 = vrot.lane.b32.xlu0 %v619_v63, %s1346_s28  ;;  %v518_v28 = vsel %vm1391_vm3, %v450_v42, %v517_v8  ;;  %516 = vst [vmem:[#allocation2 + $0x38] sm:$0xf] %v515_v27  ;;  %v647_v33 = vor.u32 %v646_v21, %v642_v18  ;;  %v632_v41 = vrot.slane %v630_v26, 1  ;;  %v637_v43 = vshll.u32 %v1201_v24, 16  ;;  %v546_v23 = vld [vmem:[#allocation2] sm:$0xe] }
  0x38   : > { %519 = vst [vmem:[#allocation2 + $0x3c] sm:$0x1] %v518_v28  ;;  %v457_v32 = vor.u32 %v455_v16, %v454_v22  ;;  %v458_v34 = vrot.slane %v454_v22, 4  ;;  %v635_v48 = vshrl.u32 %v1201_v24, 16  ;;  %v555_v16 = vld [vmem:[#allocation2 + $0x48] sm:$0xe] }
  0x39   : > { %v633_v1 = vor.u32 %v632_v41, %v628_v35  ;;  %v639_v50 = vrot.slane %v637_v43, 1  ;;  %v1216_v11 = vcombine.low %v555_v16, %v1472_v4  ;;  %v1335_v43 = vld [vmem:[%s1740_s3 + $0x18] sm:$0xff]   ;;  %vm866_vm11 = vcmask 392192  }
  0x3a   : > { %v1569_v19 = vld [vmem:[#allocation2 + $0x30] sm:$0xf]  ;;  %v542_v2 = vld [vmem:[#allocation2 + $0x34] sm:$0x1]  ;;  %v521_v37 = vsel %vm1487_vm6, %v457_v32, %v520_v30  ;;  %v524_v38 = vsel %vm1391_vm3, %v458_v34, %v523_v31  ;;  %v1332_v30 = vld [vmem:[%s1740_s3] sm:$0xff]   ;;  %vm939_vm12 = vcmask 588800  }
  0x3b   : > { %v552_v36 = vld [vmem:[#allocation2 + $0x30] sm:$0xe]  ;;  %680 = vrot.lane.b32.xlu0 %v626_v20, %s1346_s28  ;;  %v1203_v39 = vcombine.low %v1569_v19, %v542_v2  ;;  %522 = vst [vmem:[#allocation2 + $0x40] sm:$0xf] %v521_v37  ;;  %525 = vst [vmem:[#allocation2 + $0x44] sm:$0x1] %v524_v38  ;;  %v640_v61 = vor.u32 %v639_v50, %v635_v48  ;;  %1270 = vmatprep.subr.bf16.mxu0 %v1332_v30 }
  0x3c   : > { %v1213_v40 = vcombine.low %v552_v36, %v542_v2  ;;  %v1578_v49 = vld [vmem:[#allocation2] sm:$0xf]  ;;  %v735_v24 = vrot.slane %v1216_v11, 1  ;;  %1288 = vmatprep.subr.bf16.mxu1 %v1332_v30  ;;  %1271 = vmatpush3.bf16.msra.mxu0 %v1332_v30  ;;  %v1333_v34 = vld [vmem:[%s1740_s3 + $0x8] sm:$0xff]  }
  0x3d   : > { %v649_v46 = vshrl.u32 %v1203_v39, 16  ;;  %v651_v47 = vshll.u32 %v1203_v39, 16  ;;  %v536_v29 = vld [vmem:[#allocation2 + $0x4] sm:$0x1]  ;;  %1293 = vmatpush3.bf16.msra.mxu1 %v1332_v30  ;;  %1272 = vmatprep.subr.bf16.mxu0 %v1333_v34  ;;  %v1334_v39 = vld [vmem:[%s1740_s3 + $0x10] sm:$0xff]  }
  0x3e   : > { %v732_v44 = vrot.slane %v1213_v40, 1  ;;  %v1581_v52 = vld [vmem:[#allocation2 + $0x38] sm:$0xf]  ;;  %v1197_v60 = vcombine.low %v1578_v49, %v536_v29  ;;  %v1207_v27 = vcombine.low %v546_v23, %v536_v29  ;;  %1289 = vmatprep.subr.bf16.mxu1 %v1333_v34 }
  0x3f   : > { %686 = vrot.lane.b32.xlu0 %v647_v33, %s1346_s28  ;;  %v653_v51 = vrot.slane %v651_v47, 1  ;;  %v543_v53 = vld [vmem:[#allocation2 + $0x3c] sm:$0x1]  ;;  %v553_v55 = vld [vmem:[#allocation2 + $0x38] sm:$0xe] }
  0x40   : > { %748 = vrot.lane.b32.xlu1 %v732_v44, %s1347_s29  ;;  %v1204_v56 = vcombine.low %v1581_v52, %v543_v53  ;;  %v1214_v62 = vcombine.low %v553_v55, %v543_v53  ;;  %v609_v6 = vshll.u32 %v1197_v60, 16  ;;  %v607_v21 = vshrl.u32 %v1197_v60, 16  ;;  %1273 = vmatpush3.bf16.msra.mxu0 %v1333_v34 }
  0x41   : > { %v654_v57 = vor.u32 %v653_v51, %v649_v46  ;;  %v726_v4 = vrot.slane %v1207_v27, 1  ;;  %1294 = vmatpush3.bf16.msra.mxu1 %v1333_v34  ;;  %1274 = vmatprep.subr.bf16.mxu0 %v1334_v39 }
  0x42   : > { %v1584_v58 = vld [vmem:[#allocation2 + $0x40] sm:$0xf]  ;;  %v544_v59 = vld [vmem:[#allocation2 + $0x44] sm:$0x1]  ;;  %v658_v63 = vshll.u32 %v1204_v56, 16  ;;  %v656_v13 = vshrl.u32 %v1204_v56, 16  ;;  %1290 = vmatprep.subr.bf16.mxu1 %v1334_v39 }
  0x43   : > { %688 = vrot.lane.b32.xlu0 %v654_v57, %s1346_s28  ;;  %v1205_v0 = vcombine.low %v1584_v58, %v544_v59  ;;  %v554_v9 = vld [vmem:[#allocation2 + $0x40] sm:$0xe]  ;;  %v733_v14 = vrot.slane %v1214_v62, 1  ;;  %v611_v22 = vrot.slane %v609_v6, 1 }
  0x44   : > { %682 = vrot.lane.b32.xlu1 %v633_v1, %s1346_s28  ;;  %v660_v8 = vrot.slane %v658_v63, 1  ;;  %v1215_v17 = vcombine.low %v554_v9, %v544_v59  ;;  %1275 = vmatpush3.bf16.msra.mxu0 %v1334_v39 }
  0x45   : > { %v663_v10 = vshrl.u32 %v1205_v0, 16  ;;  %v665_v12 = vshll.u32 %v1205_v0, 16  ;;  %v612_v26 = vor.u32 %v611_v22, %v607_v21  ;;  %1295 = vmatpush3.bf16.msra.mxu1 %v1334_v39  ;;  %1276 = vmatprep.subr.bf16.mxu0 %v1335_v43 }
  0x46   : > { %v661_v42 = vor.u32 %v660_v8, %v656_v13  ;;  %v734_v20 = vrot.slane %v1215_v17, 1  ;;  %1291 = vmatprep.subr.bf16.mxu1 %v1335_v43 }
  0x47   : > { %v667_v15 = vrot.slane %v665_v12, 1 }
  0x48   : > { %684 = vrot.lane.b32.xlu1 %v640_v61, %s1346_s28  ;;  %1277 = vmatpush3.bf16.msra.mxu0 %v1335_v43 }
  0x49   : > { %v668_v18 = vor.u32 %v667_v15, %v663_v10  ;;  %1296 = vmatpush3.bf16.msra.mxu1 %v1335_v43 }
  0x4b   : > { %692 = vrot.lane.b32.xlu0 %v668_v18, %s1346_s28 }
  0x4c   : > { %750 = vrot.lane.b32.xlu1 %v733_v14, %s1347_s29 }
  0x4f   : > { %752 = vrot.lane.b32.xlu0 %v734_v20, %s1347_s29 }
  0x50   : > { %690 = vrot.lane.b32.xlu1 %v661_v42, %s1346_s28 }
  0x53   : > { %676 = vrot.lane.b32.xlu0 %v612_v26, %s1346_s28 }
  0x54   : > { %754 = vrot.lane.b32.xlu1 %v735_v24, %s1347_s29 }
  0x58   : > { %736 = vrot.lane.b32.xlu1 %v726_v4, %s1347_s29 }
  0x95   : > { %v1599_v28 = vpop.permute.xlu0 %694 }
  0x96   : > { %v786_v9 = vsel %vm756_vm8, %v1470_v3, %v1599_v28 }
  0xa0   : > { %v741_v31 = vpop.permute.xlu1 %740 }
  0xa1   : > { %v739_v32 = vpop.permute.xlu0 %738 }
  0xa4   : > { %v743_v2 = vpop.permute.xlu1 %742 }
  0xa5   : > { %v745_v35 = vpop.permute.xlu0 %744 }
  0xa8   : > { %v747_v38 = vpop.permute.xlu1 %746 }
  0xa9   : > { %v679_v36 = vpop.permute.xlu0 %678 }
  0xaa   : > { %v762_v33 = vsel %vm756_vm8, %v1535_v25, %v679_v36 }
  0xab   : > { %v1610_v37 = vsel %vm787_vm7, %v762_v33, %v739_v32 }
  0xac   : > { %816 = vrot.lane.b32.xlu0 %v1610_v37, %s1348_s9 }
  0xad   : > { %v681_v40 = vpop.permute.xlu0 %680 }
  0xae   : > { %v765_v41 = vsel %vm756_vm8, %v1529_v7, %v681_v40  ;;  %v1336_v7 = vld [vmem:[%s1740_s3 + $0x20] ss:$0 sps:$4 sm:$0xff]  }
  0xaf   : > { %v1620_v25 = vsel %vm787_vm7, %v765_v41, %v741_v31  ;;  %1298 = vmatprep.subr.msk.bf16.mxu0 %vm952_vm9, %v1336_v7  ;;  %1299 = vmatprep.subr.msk.bf16.mxu1 %vm952_vm9, %v1336_v7  ;;  %v954_v48 = vsel %vm952_vm9, %v1336_v7, 0 }
  0xb0   : > { %818 = vrot.lane.b32.xlu1 %v1620_v25, %s1348_s9  ;;  %1279 = vmatpush3.bf16.msra.mxu0 %v954_v48 }
  0xb1   : > { %1297 = vmatpush3.bf16.msra.mxu1 %v954_v48  ;;  %v687_v1 = vpop.permute.xlu0 %686 }
  0xb2   : > { %v749_v44 = vpop.permute.xlu1 %748  ;;  %v774_v56 = vsel %vm756_vm8, %v1542_v45, %v687_v1 }
  0xb3   : > { %v799_v60 = vsel %vm787_vm7, %v774_v56, %v747_v38 }
  0xb5   : > { %v689_v55 = vpop.permute.xlu0 %688 }
  0xb6   : > { %v683_v46 = vpop.permute.xlu1 %682  ;;  %v777_v61 = vsel %vm756_vm8, %v1569_v19, %v689_v55 }
  0xb7   : > { %v768_v47 = vsel %vm756_vm8, %v1545_v54, %v683_v46  ;;  %v801_v45 = vsel %vm787_vm7, %v777_v61, %v749_v44 }
  0xb8   : > { %v795_v29 = vsel %vm787_vm7, %v768_v47, %v743_v2 }
  0xb9   : > { %820 = vrot.lane.b32.xlu0 %v795_v29, %s1348_s9 }
  0xba   : > { %v685_v50 = vpop.permute.xlu1 %684 }
  0xbb   : > { %v771_v51 = vsel %vm756_vm8, %v1556_v5, %v685_v50 }
  0xbc   : > { %v1637_v53 = vsel %vm787_vm7, %v771_v51, %v745_v35 }
  0xbd   : > { %833 = vrot.lane.b32.xlu0 %v1620_v25, %s1349_s16  ;;  %822 = vrot.lane.b32.xlu1 %v1637_v53, %s1348_s9  ;;  %v693_v59 = vpop.permute.xlu0 %692 }
  0xbe   : > { %v751_v54 = vpop.permute.xlu1 %750  ;;  %v783_v63 = vsel %vm756_vm8, %v1584_v58, %v693_v59 }
  0xc1   : > { %837 = vrot.lane.b32.xlu0 %v1637_v53, %s1349_s16  ;;  %835 = vrot.lane.b32.xlu1 %v795_v29, %s1349_s16  ;;  %v753_v0 = vpop.permute.xlu0 %752 }
  0xc2   : > { %v691_v57 = vpop.permute.xlu1 %690 }
  0xc3   : > { %v780_v5 = vsel %vm756_vm8, %v1581_v52, %v691_v57  ;;  %v805_v52 = vsel %vm787_vm7, %v783_v63, %v753_v0 }
  0xc4   : > { %v803_v62 = vsel %vm787_vm7, %v780_v5, %v751_v54 }
  0xc5   : > { %824 = vrot.lane.b32.xlu0 %v799_v60, %s1348_s9  ;;  %839 = vrot.lane.b32.xlu1 %v799_v60, %s1349_s16  ;;  %v677_v58 = vpop.permute.xlu0 %676 }
  0xc6   : > { %v755_v19 = vpop.permute.xlu1 %754  ;;  %v759_v8 = vsel %vm756_vm8, %v1578_v49, %v677_v58 }
  0xc7   : > { %v807_v10 = vsel %vm787_vm7, %v786_v9, %v755_v19 }
  0xc9   : > { %828 = vrot.lane.b32.xlu0 %v803_v62, %s1348_s9  ;;  %826 = vrot.lane.b32.xlu1 %v801_v45, %s1348_s9 }
  0xca   : > { %v737_v12 = vpop.permute.xlu1 %736 }
  0xcb   : > { %v789_v17 = vsel %vm787_vm7, %v759_v8, %v737_v12 }
  0xcd   : > { %841 = vrot.lane.b32.xlu0 %v801_v45, %s1349_s16  ;;  %830 = vrot.lane.b32.xlu1 %v805_v52, %s1348_s9 }
  0xd1   : > { %845 = vrot.lane.b32.xlu0 %v805_v52, %s1349_s16  ;;  %843 = vrot.lane.b32.xlu1 %v803_v62, %s1349_s16 }
  0xd5   : > { %847 = vrot.lane.b32.xlu1 %v807_v10, %s1349_s16 }
 0x11e   : > { %v817_v13 = vpop.permute.xlu0 %816 }
 0x11f   : > { %v851_v18 = vsel %vm849_vm10, %v789_v17, %v817_v13 }
 0x122   : > { %v819_v6 = vpop.permute.xlu1 %818 }
 0x123   : > { %v853_v3 = vsel %vm849_vm10, %v1610_v37, %v819_v6 }
 0x12b   : > { %v821_v14 = vpop.permute.xlu0 %820 }
 0x12c   : > { %v855_v49 = vsel %vm849_vm10, %v1620_v25, %v821_v14 }
 0x12f   : > { %v823_v15 = vpop.permute.xlu1 %822  ;;  %v834_v16 = vpop.permute.xlu0 %833 }
 0x130   : > { %v868_v20 = vsel %vm866_vm11, %v851_v18, %v834_v16  ;;  %v857_v23 = vsel %vm849_vm10, %v795_v29, %v823_v15 }
 0x133   : > { %v836_v11 = vpop.permute.xlu1 %835  ;;  %v838_v42 = vpop.permute.xlu0 %837 }
 0x134   : > { %v870_v21 = vsel %vm866_vm11, %v853_v3, %v836_v11  ;;  %v872_v27 = vsel %vm866_vm11, %v855_v49, %v838_v42 }
 0x135   : > { %v1217_v22 = vcombine.low %v868_v20, %v870_v21 }
 0x137   : > { %v840_v24 = vpop.permute.xlu1 %839  ;;  %1280 = vmatprep.mubr.msk.bf16.mxu0 %vm939_vm12, %v1217_v22  ;;  %v825_v26 = vpop.permute.xlu0 %824 }
 0x138   : > { %v874_v4 = vsel %vm866_vm11, %v857_v23, %v840_v24  ;;  %v859_v35 = vsel %vm849_vm10, %v1637_v53, %v825_v26 }
 0x139   : > { %v1218_v28 = vcombine.low %v872_v27, %v874_v4 }
 0x13b   : > { %v827_v30 = vpop.permute.xlu1 %826  ;;  %1281 = vmatmul.mubr.msk.bf16.vlgmr.msra.gmra.mrb[0].mxu0 %vm939_vm12, %v1218_v28  ;;  %v829_v31 = vpop.permute.xlu0 %828 }
 0x13c   : > { %v861_v2 = vsel %vm849_vm10, %v799_v60, %v827_v30  ;;  %v863_v40 = vsel %vm849_vm10, %v801_v45, %v829_v31 }
 0x13f   : > { %v831_v32 = vpop.permute.xlu1 %830  ;;  %v842_v34 = vpop.permute.xlu0 %841 }
 0x140   : > { %v876_v33 = vsel %vm866_vm11, %v859_v35, %v842_v34  ;;  %v865_v41 = vsel %vm849_vm10, %v803_v62, %v831_v32 }
 0x143   : > { %v844_v36 = vpop.permute.xlu1 %843  ;;  %v846_v38 = vpop.permute.xlu0 %845 }
 0x144   : > { %v878_v37 = vsel %vm866_vm11, %v861_v2, %v844_v36  ;;  %v880_v43 = vsel %vm866_vm11, %v863_v40, %v846_v38 }
 0x145   : > { %v1219_v39 = vcombine.low %v876_v33, %v878_v37 }
 0x147   : > { %v848_v25 = vpop.permute.xlu1 %847  ;;  %1284 = vmatprep.mubr.msk.bf16.mxu1 %vm939_vm12, %v1219_v39 }
 0x148   : > { %v882_v44 = vsel %vm866_vm11, %v865_v41, %v848_v25 }
 0x149   : > { %v1220_v7 = vcombine.low %v880_v43, %v882_v44 }
 0x14b   : > { %1285 = vmatmul.mubr.msk.bf16.vlgmr.msra.gmra.mrb[0].mxu1 %vm939_vm12, %v1220_v7 }
 0x20e   : > { %v1282_v46 = vpop.f32.mrb[0].mxu0 }
 0x20f   : > { %v1075_v47 = vpack.c.bf16 %v1282_v46, %v1282_v46  ;;  %v990_v48 = vpop.f32.mrb[1].mxu0  ;;  %v1045_v51 = vmul.f32 %v1282_v46, %v1282_v46  ;;  %v1024_v60 = vsel %vm756_vm8, %v1282_v46, 0.0 }
 0x210   : > { %v1043_v29 = vmul.f32 %v990_v48, %v990_v48  ;;  %v1073_v1 = vpack.c.bf16 %v990_v48, %v990_v48  ;;  %v1283_v50 = vpop.f32.mrb[2].mxu0  ;;  %v1021_v55 = vsel %vm756_vm8, %v990_v48, 0.0 }
 0x211   : > { %1083 = vst.msk [vmem:[%s1694_s22 + $0x8] sm:$0xf] %vm291_vm0, %v1075_v47  ;;  %v1076_v53 = vpack.c.bf16 %v1283_v50, %v1283_v50  ;;  %v993_v54 = vpop.f32.mrb[3].mxu0  ;;  %v1046_v62 = vmul.f32 %v1283_v50, %v1283_v50  ;;  %v1054_v52 = vsel %vm756_vm8, %v1045_v51, 0.0  ;;  %v1026_v19 = vsel %vm756_vm8, %v1283_v50, 0.0 }
 0x212   : > { %1081 = vst.msk [vmem:[%s1694_s22] sm:$0xf] %vm291_vm0, %v1073_v1  ;;  %v1022_v56 = vsel %vm756_vm8, %v993_v54, 0.0  ;;  %v1044_v57 = vmul.f32 %v993_v54, %v993_v54  ;;  %v1074_v5 = vpack.c.bf16 %v993_v54, %v993_v54  ;;  %v1051_v61 = vsel %vm756_vm8, %v1043_v29, 0.0 }
 0x213   : > { %1084 = vst.msk [vmem:[%s1694_s22 + $0xc] sm:$0xf] %vm291_vm0, %v1076_v53  ;;  %v1023_v59 = vadd.f32 %v1022_v56, %v1021_v55  ;;  %v1056_v58 = vsel %vm756_vm8, %v1046_v62, 0.0 }
 0x214   : > { %v1052_v45 = vsel %vm756_vm8, %v1044_v57, 0.0  ;;  %1082 = vst.msk [vmem:[%s1694_s22 + $0x4] sm:$0xf] %vm291_vm0, %v1074_v5 }
 0x215   : > { %v1025_v63 = vadd.f32 %v1024_v60, %v1023_v59  ;;  %v1053_v0 = vadd.f32 %v1052_v45, %v1051_v61 }
 0x217   : > { %v1055_v9 = vadd.f32 %v1054_v52, %v1053_v0  ;;  %v1027_v10 = vadd.f32 %v1026_v19, %v1025_v63 }
 0x219   : > { %v1057_v12 = vadd.f32 %v1056_v58, %v1055_v9 }
 0x21e   : > { %v1286_v13 = vpop.f32.mrb[0].mxu1 }
 0x21f   : > { %v1079_v6 = vpack.c.bf16 %v1286_v13, %v1286_v13  ;;  %v1006_v14 = vpop.f32.mrb[1].mxu1  ;;  %v1049_v18 = vmul.f32 %v1286_v13, %v1286_v13  ;;  %v1032_v26 = vsel %vm756_vm8, %v1286_v13, 0.0 }
 0x220   : > { %v1028_v8 = vsel %vm756_vm8, %v1006_v14, 0.0  ;;  %v1047_v15 = vmul.f32 %v1006_v14, %v1006_v14  ;;  %v1077_v16 = vpack.c.bf16 %v1006_v14, %v1006_v14  ;;  %v1287_v17 = vpop.f32.mrb[2].mxu1 }
 0x221   : > { %1087 = vst.msk [vmem:[%s1694_s22 + $0x18] sm:$0xf] %vm291_vm0, %v1079_v6  ;;  %v1029_v3 = vadd.f32 %v1028_v8, %v1027_v10  ;;  %v1009_v11 = vpop.f32.mrb[3].mxu1  ;;  %v1080_v20 = vpack.c.bf16 %v1287_v17, %v1287_v17  ;;  %v1050_v27 = vmul.f32 %v1287_v17, %v1287_v17  ;;  %v1062_v31 = vsel %vm756_vm8, %v1049_v18, 0.0 }
 0x222   : > { %v1058_v42 = vsel %vm756_vm8, %v1047_v15, 0.0  ;;  %1085 = vst.msk [vmem:[%s1694_s22 + $0x10] sm:$0xf] %vm291_vm0, %v1077_v16  ;;  %v1030_v21 = vsel %vm756_vm8, %v1009_v11, 0.0  ;;  %v1048_v22 = vmul.f32 %v1009_v11, %v1009_v11  ;;  %v1078_v24 = vpack.c.bf16 %v1009_v11, %v1009_v11 }
 0x223   : > { %v1059_v49 = vadd.f32 %v1058_v42, %v1057_v12  ;;  %v1031_v23 = vadd.f32 %v1030_v21, %v1029_v3  ;;  %1088 = vst.msk [vmem:[%s1694_s22 + $0x1c] sm:$0xf] %vm291_vm0, %v1080_v20  ;;  %v1034_v32 = vsel %vm756_vm8, %v1287_v17, 0.0  ;;  %v1064_v2 = vsel %vm756_vm8, %v1050_v27, 0.0 }
 0x224   : > { %v1060_v4 = vsel %vm756_vm8, %v1048_v22, 0.0  ;;  %1086 = vst.msk [vmem:[%s1694_s22 + $0x14] sm:$0xf] %vm291_vm0, %v1078_v24 }
 0x225   : > { %v1033_v28 = vadd.f32 %v1032_v26, %v1031_v23  ;;  %v1061_v30 = vadd.f32 %v1060_v4, %v1059_v49 }
 0x227   : > { %v1035_v34 = vadd.f32 %v1034_v32, %v1033_v28  ;;  %v1063_v35 = vadd.f32 %v1062_v31, %v1061_v30 }
 0x229   : > { %v1036_v36 = vrot.slane %v1035_v34, 4  ;;  %v1065_v33 = vadd.f32 %v1064_v2, %v1063_v35 }
 0x22b   : > { %v1037_v37 = vadd.f32 %v1036_v36, %v1035_v34  ;;  %v1066_v38 = vrot.slane %v1065_v33, 4 }
 0x22d   : > { %v1038_v39 = vrot.slane %v1037_v37, 2  ;;  %v1067_v40 = vadd.f32 %v1066_v38, %v1065_v33 }
 0x22f   : > { %v1039_v41 = vadd.f32 %v1038_v39, %v1037_v37  ;;  %v1068_v25 = vrot.slane %v1067_v40, 2 }
 0x231   : > { %v1040_v43 = vrot.slane %v1039_v41, 1  ;;  %v1069_v44 = vadd.f32 %v1068_v25, %v1067_v40 }
 0x233   : > { %v1041_v7 = vadd.f32 %v1040_v43, %v1039_v41  ;;  %v1070_v46 = vrot.slane %v1069_v44, 1 }
 0x235   : > { %v1071_v47 = vadd.f32 %v1070_v46, %v1069_v44  ;;  %1089 = vst.msk [vmem:[%s235_s25] sm:$0x1] %vm293_vm1, %v1041_v7 }
 0x237   : > { %1090 = vst.msk [vmem:[%s235_s25 + $0x1] sm:$0x1] %vm293_vm1, %v1071_v47 }
 0x238 PF: > { %s16_s18 = sadd.s32 1, %s1343_s18  }
 0x239   : > { %p13_p4 = scmp.ge.s32.totalorder %s16_s18, 4  }
 0x23b   :  { %15 = sbr.rel (!%p13_p4) target bundleno = 1 (0x1), region = 80 }

</bundles_post_ra>
